<compile_context>
chip_gen: v7x
topology: tpu7x:2x2x1
jax: 0.10.0
libtpu: 0.0.40
codegen_flags: <defaults>
</compile_context>

<pallas_src>
import math

import jax
import jax.numpy as jnp
import numpy as np
from jax.experimental import pallas as pl
from jax.experimental.pallas import tpu as pltpu

# ---- model / problem sizes (small, consistent with the module) ----
B = 2          # batch
S = 8          # sequence length
F = 32         # feature_dim (d_model)
P = 16         # param_dim
H = 4          # attention heads
DFF = 512      # FeedForward hidden size (module default d_ff=512)
DH = F // H    # head dim
N = B * S      # rows in the flattened (batch*seq) slab
HN = H * N     # rows in the head-stacked attention layout
EPS = 1e-6
NEG_INF = -1e30


def _norm_layer(x, alpha, bias, n):
    """alpha * (x - mean) / (std_unbiased + eps) + bias  (torch semantics)."""
    mean = jnp.mean(x, axis=-1, keepdims=True)
    xc = x - mean
    var = jnp.sum(xc * xc, axis=-1, keepdims=True) / (n - 1)   # unbiased (torch.std)
    std = jnp.sqrt(var)
    inv = pl.reciprocal(std + EPS, approx=False)               # EUP, exact
    return alpha * xc * inv + bias


def encoder_layer_kernel(
    fx_ref, px_ref, mask_ref,
    wqkv_ref, bqkv_ref, wo_ref, bo_ref,
    a1_ref, g1_ref, a2_ref, g2_ref,
    w1_ref, c1_ref, w2_ref, c2_ref,
    wpf_ref, wpp_ref, bp_ref,
    fout_ref, pout_ref,
):
    x = fx_ref[...].astype(jnp.float32)     # (N, F)
    p = px_ref[...].astype(jnp.float32)     # (N, P)

    # ---------------- norm_1 ----------------
    x1 = _norm_layer(x, a1_ref[...], g1_ref[...], F)

    # ---------------- multi-head self-attention ----------------
    # Fused QKV projection: one lane-dense (16,32)x(32,96) MXU op.
    qkv = (jnp.dot(x1, wqkv_ref[...], preferred_element_type=jnp.float32)
           + bqkv_ref[...])                                     # (N, 3F)

    # Head-stack along SUBLANES: row h*N + n holds head h of token n.
    # (static lane slices of one vreg + aligned sublane concat; no 3-D arrays)
    q_s = jnp.concatenate(
        [qkv[:, h * DH:(h + 1) * DH] for h in range(H)], axis=0)            # (HN, DH)
    k_s = jnp.concatenate(
        [qkv[:, F + h * DH:F + (h + 1) * DH] for h in range(H)], axis=0)    # (HN, DH)
    v_s = jnp.concatenate(
        [qkv[:, 2 * F + h * DH:2 * F + (h + 1) * DH] for h in range(H)], axis=0)

    # All heads / all batch elements in ONE score matmul; the additive mask
    # (-1e30 off the per-(head,batch) diagonal blocks) restores independence.
    sc = jnp.einsum('nd,md->nm', q_s, k_s,
                    preferred_element_type=jnp.float32)                      # (HN, HN)
    sc = sc * (1.0 / math.sqrt(DH)) + mask_ref[...]
    sc = sc - jnp.max(sc, axis=-1, keepdims=True)
    e = jnp.exp(sc)
    probs = e * pl.reciprocal(jnp.sum(e, axis=-1, keepdims=True),
                              approx=False)                                  # softmax
    o_s = jnp.dot(probs, v_s, preferred_element_type=jnp.float32)            # (HN, DH)

    # Out-projection with the original (F,F) Wo:
    #   concat(heads) @ Wo  ==  sum_h  o_h @ Wo[h*DH:(h+1)*DH, :]
    wo = wo_ref[...]
    attn = jnp.dot(o_s[0:N, :], wo[0:DH, :], preferred_element_type=jnp.float32)
    for h in range(1, H):
        attn = attn + jnp.dot(o_s[h * N:(h + 1) * N, :],
                              wo[h * DH:(h + 1) * DH, :],
                              preferred_element_type=jnp.float32)
    attn = attn + bo_ref[...]                                                # (N, F)

    # residual (dropout_1 is identity at inference)
    x2 = x1 + attn

    # ---------------- norm_2 + FeedForward ----------------
    x3 = _norm_layer(x2, a2_ref[...], g2_ref[...], F)
    h1 = jnp.maximum(
        jnp.dot(x3, w1_ref[...], preferred_element_type=jnp.float32) + c1_ref[...],
        0.0)
    # TODO(synk): FeedForward's nn.Dropout is identity in eval mode; no RNG here.
    ff = jnp.dot(h1, w2_ref[...], preferred_element_type=jnp.float32) + c2_ref[...]
    x4 = x2 + ff                                    # residual (dropout_2 identity)

    fout_ref[...] = x4.astype(fout_ref.dtype)

    # ---------------- param_update on concat([feature, param]) ----------------
    p_out = (jnp.dot(x4, wpf_ref[...], preferred_element_type=jnp.float32)
             + jnp.dot(p, wpp_ref[...], preferred_element_type=jnp.float32)
             + bp_ref[...])
    pout_ref[...] = p_out.astype(pout_ref.dtype)


def prepare_params(params):
    """One-time host-side relayout (hoisted out of the per-call path)."""
    (wq, bq, wk, bk, wv, bv, wo, bo,
     a1, g1, a2, g2, w1, c1, w2, c2, wpf, wpp, bp) = params
    wqkv = jnp.concatenate([wq, wk, wv], axis=1)     # (F, 3F)
    bqkv = jnp.concatenate([bq, bk, bv], axis=1)     # (1, 3F)
    # Block-diagonal additive mask for the head-stacked (HN, HN) score matrix:
    # row r = h*N + b*S + s  ->  r // S == h*B + b uniquely identifies (head, batch).
    blk = np.arange(HN) // S
    mask = np.where(blk[:, None] == blk[None, :], 0.0, NEG_INF).astype(np.float32)
    return (jnp.asarray(mask), wqkv, bqkv, wo, bo,
            a1, g1, a2, g2, w1, c1, w2, c2, wpf, wpp, bp)


def encoder_layer(fx, px, prepared):
    fx2 = fx.reshape(N, F)          # collapse batch into one slab: no grid at all
    px2 = px.reshape(N, P)

    vmem = pl.BlockSpec(memory_space=pltpu.MemorySpace.VMEM)
    n_inputs = 2 + len(prepared)    # 18 operands, all whole-array VMEM blocks

    f_out, p_out = pl.pallas_call(
        encoder_layer_kernel,
        out_shape=(jax.ShapeDtypeStruct((N, F), jnp.float32),
                   jax.ShapeDtypeStruct((N, P), jnp.float32)),
        in_specs=[vmem] * n_inputs,
        out_specs=(vmem, vmem),
        # No grid, no dimension_semantics: single invocation, ~180 KiB total
        # footprint — nothing to pipeline or shard on v5e/v6e/v7x.
    )(fx2, px2, *prepared)

    return f_out.reshape(B, S, F), p_out.reshape(B, S, P)


# ---------------- pure-JAX reference (for a sanity check) ----------------
def reference(fx, px, params):
    (wq, bq, wk, bk, wv, bv, wo, bo,
     a1, g1, a2, g2, w1, c1, w2, c2, wpf, wpp, bp) = params

    def norm(x, alpha, bias):
        mean = jnp.mean(x, axis=-1, keepdims=True)
        xc = x - mean
        std = jnp.sqrt(jnp.sum(xc * xc, axis=-1, keepdims=True) / (F - 1))
        return alpha * xc / (std + EPS) + bias

    x1 = norm(fx, a1, g1)
    q = (x1 @ wq + bq).reshape(B, S, H, DH).transpose(0, 2, 1, 3)
    k = (x1 @ wk + bk).reshape(B, S, H, DH).transpose(0, 2, 1, 3)
    v = (x1 @ wv + bv).reshape(B, S, H, DH).transpose(0, 2, 1, 3)
    sc = jnp.einsum("bhqd,bhkd->bhqk", q, k) / math.sqrt(DH)
    pr = jax.nn.softmax(sc, axis=-1)
    o = jnp.einsum("bhqk,bhkd->bhqd", pr, v).transpose(0, 2, 1, 3).reshape(B, S, F)
    attn = o @ wo + bo
    x2 = x1 + attn
    x3 = norm(x2, a2, g2)
    ff = jnp.maximum(x3 @ w1 + c1, 0.0) @ w2 + c2
    x4 = x2 + ff
    p_out = x4 @ wpf + px @ wpp + bp
    return x4, p_out


def make_params(key):
    ks = jax.random.split(key, 16)
    n = lambda k, shp: (jax.random.normal(k, shp, jnp.float32) * 0.05)
    wq, bq = n(ks[0], (F, F)), n(ks[1], (1, F))
    wk, bk = n(ks[2], (F, F)), n(ks[3], (1, F))
    wv, bv = n(ks[4], (F, F)), n(ks[5], (1, F))
    wo, bo = n(ks[6], (F, F)), n(ks[7], (1, F))
    a1, g1 = jnp.ones((1, F), jnp.float32), jnp.zeros((1, F), jnp.float32)
    a2, g2 = jnp.ones((1, F), jnp.float32), jnp.zeros((1, F), jnp.float32)
    w1, c1 = n(ks[8], (F, DFF)), n(ks[9], (1, DFF))
    w2, c2 = n(ks[10], (DFF, F)), n(ks[11], (1, F))
    wpf = n(ks[12], (F, P))     # param_update weight rows acting on feature part
    wpp = n(ks[13], (P, P))     # rows acting on param part
    bp = n(ks[14], (1, P))
    return (wq, bq, wk, bk, wv, bv, wo, bo,
            a1, g1, a2, g2, w1, c1, w2, c2, wpf, wpp, bp)


if __name__ == "__main__":
    key = jax.random.PRNGKey(0)
    k1, k2, k3 = jax.random.split(key, 3)
    feature_x = jax.random.normal(k1, (B, S, F), jnp.float32)
    param_x = jax.random.normal(k2, (B, S, P), jnp.float32)
    params = make_params(k3)
    prepared = prepare_params(params)          # one-time weight relayout

    f_out, p_out = encoder_layer(feature_x, param_x, prepared)
    jax.block_until_ready((f_out, p_out))

    f_ref, p_ref = reference(feature_x, param_x, params)
    assert jnp.allclose(f_out, f_ref, atol=1e-4, rtol=1e-4), "feature mismatch"
    assert jnp.allclose(p_out, p_ref, atol=1e-4, rtol=1e-4), "param mismatch"

    print("KERNEL_OK")
</pallas_src>

<mosaic_0001>
module attributes {stable_mosaic.version = 11 : i64} {
  func.func @encoder_layer_kernel(%arg0: memref<16x32xf32, #tpu.memory_space<vmem>>, %arg1: memref<16x16xf32, #tpu.memory_space<vmem>>, %arg2: memref<64x64xf32, #tpu.memory_space<vmem>>, %arg3: memref<32x96xf32, #tpu.memory_space<vmem>>, %arg4: memref<1x96xf32, #tpu.memory_space<vmem>>, %arg5: memref<32x32xf32, #tpu.memory_space<vmem>>, %arg6: memref<1x32xf32, #tpu.memory_space<vmem>>, %arg7: memref<1x32xf32, #tpu.memory_space<vmem>>, %arg8: memref<1x32xf32, #tpu.memory_space<vmem>>, %arg9: memref<1x32xf32, #tpu.memory_space<vmem>>, %arg10: memref<1x32xf32, #tpu.memory_space<vmem>>, %arg11: memref<32x512xf32, #tpu.memory_space<vmem>>, %arg12: memref<1x512xf32, #tpu.memory_space<vmem>>, %arg13: memref<512x32xf32, #tpu.memory_space<vmem>>, %arg14: memref<1x32xf32, #tpu.memory_space<vmem>>, %arg15: memref<32x16xf32, #tpu.memory_space<vmem>>, %arg16: memref<16x16xf32, #tpu.memory_space<vmem>>, %arg17: memref<1x16xf32, #tpu.memory_space<vmem>>, %arg18: memref<16x32xf32, #tpu.memory_space<vmem>>, %arg19: memref<16x16xf32, #tpu.memory_space<vmem>>) attributes {dimension_semantics = [], scalar_prefetch = 0 : i64, scratch_operands = 0 : i64, tpu.core_type = #tpu.core_type<tc>} {
    %c0 = arith.constant 0 : index
    %c0_0 = arith.constant 0 : index
    %0 = vector.load %arg0[%c0, %c0_0] : memref<16x32xf32, #tpu.memory_space<vmem>>, vector<16x32xf32>
    %c0_1 = arith.constant 0 : index
    %c0_2 = arith.constant 0 : index
    %1 = vector.load %arg1[%c0_1, %c0_2] : memref<16x16xf32, #tpu.memory_space<vmem>>, vector<16x16xf32>
    %c0_3 = arith.constant 0 : index
    %c0_4 = arith.constant 0 : index
    %2 = vector.load %arg7[%c0_3, %c0_4] : memref<1x32xf32, #tpu.memory_space<vmem>>, vector<1x32xf32>
    %c0_5 = arith.constant 0 : index
    %c0_6 = arith.constant 0 : index
    %3 = vector.load %arg8[%c0_5, %c0_6] : memref<1x32xf32, #tpu.memory_space<vmem>>, vector<1x32xf32>
    %cst = arith.constant dense<0.000000e+00> : vector<16xf32>
    %4 = vector.multi_reduction <add>, %0, %cst [1] : vector<16x32xf32> to vector<16xf32>
    %5 = vector.shape_cast %4 : vector<16xf32> to vector<16x1xf32>
    %cst_7 = arith.constant 3.200000e+01 : f32
    %6 = vector.broadcast %cst_7 : f32 to vector<16x1xf32>
    %7 = arith.divf %5, %6 : vector<16x1xf32>
    %8 = vector.broadcast %7 : vector<16x1xf32> to vector<16x32xf32>
    %9 = arith.subf %0, %8 : vector<16x32xf32>
    %10 = arith.mulf %9, %9 : vector<16x32xf32>
    %cst_8 = arith.constant dense<0.000000e+00> : vector<16xf32>
    %11 = vector.multi_reduction <add>, %10, %cst_8 [1] : vector<16x32xf32> to vector<16xf32>
    %12 = vector.shape_cast %11 : vector<16xf32> to vector<16x1xf32>
    %cst_9 = arith.constant 3.100000e+01 : f32
    %13 = vector.broadcast %cst_9 : f32 to vector<16x1xf32>
    %14 = arith.divf %12, %13 : vector<16x1xf32>
    %15 = math.sqrt %14 : vector<16x1xf32>
    %cst_10 = arith.constant 9.99999997E-7 : f32
    %16 = vector.broadcast %cst_10 : f32 to vector<16x1xf32>
    %17 = arith.addf %15, %16 : vector<16x1xf32>
    %18 = tpu.reciprocal %17 : vector<16x1xf32> -> vector<16x1xf32>
    %19 = vector.broadcast %2 : vector<1x32xf32> to vector<16x32xf32>
    %20 = arith.mulf %19, %9 : vector<16x32xf32>
    %21 = vector.broadcast %18 : vector<16x1xf32> to vector<16x32xf32>
    %22 = arith.mulf %20, %21 : vector<16x32xf32>
    %23 = vector.broadcast %3 : vector<1x32xf32> to vector<16x32xf32>
    %24 = arith.addf %22, %23 : vector<16x32xf32>
    %c0_11 = arith.constant 0 : index
    %c0_12 = arith.constant 0 : index
    %25 = vector.load %arg3[%c0_11, %c0_12] : memref<32x96xf32, #tpu.memory_space<vmem>>, vector<32x96xf32>
    %cst_13 = arith.constant dense<0.000000e+00> : vector<16x96xf32>
    %26 = tpu.matmul %24, %25, %cst_13 {dimension_numbers = #tpu.dot_dimension_numbers<[1], [0], [0], [1], [0, 0, 1, 1], [], []>} : vector<16x32xf32>, vector<32x96xf32>, vector<16x96xf32> -> vector<16x96xf32>
    %c0_14 = arith.constant 0 : index
    %c0_15 = arith.constant 0 : index
    %27 = vector.load %arg4[%c0_14, %c0_15] : memref<1x96xf32, #tpu.memory_space<vmem>>, vector<1x96xf32>
    %28 = vector.broadcast %27 : vector<1x96xf32> to vector<16x96xf32>
    %29 = arith.addf %26, %28 : vector<16x96xf32>
    %30 = vector.extract_strided_slice %29 {offsets = [0, 0], sizes = [16, 8], strides = [1, 1]} : vector<16x96xf32> to vector<16x8xf32>
    %31 = vector.extract_strided_slice %29 {offsets = [0, 8], sizes = [16, 8], strides = [1, 1]} : vector<16x96xf32> to vector<16x8xf32>
    %32 = vector.extract_strided_slice %29 {offsets = [0, 16], sizes = [16, 8], strides = [1, 1]} : vector<16x96xf32> to vector<16x8xf32>
    %33 = vector.extract_strided_slice %29 {offsets = [0, 24], sizes = [16, 8], strides = [1, 1]} : vector<16x96xf32> to vector<16x8xf32>
    %34 = tpu.concatenate %30, %31, %32, %33 in 0 : vector<16x8xf32>, vector<16x8xf32>, vector<16x8xf32>, vector<16x8xf32> -> vector<64x8xf32>
    %35 = vector.extract_strided_slice %29 {offsets = [0, 32], sizes = [16, 8], strides = [1, 1]} : vector<16x96xf32> to vector<16x8xf32>
    %36 = vector.extract_strided_slice %29 {offsets = [0, 40], sizes = [16, 8], strides = [1, 1]} : vector<16x96xf32> to vector<16x8xf32>
    %37 = vector.extract_strided_slice %29 {offsets = [0, 48], sizes = [16, 8], strides = [1, 1]} : vector<16x96xf32> to vector<16x8xf32>
    %38 = vector.extract_strided_slice %29 {offsets = [0, 56], sizes = [16, 8], strides = [1, 1]} : vector<16x96xf32> to vector<16x8xf32>
    %39 = tpu.concatenate %35, %36, %37, %38 in 0 : vector<16x8xf32>, vector<16x8xf32>, vector<16x8xf32>, vector<16x8xf32> -> vector<64x8xf32>
    %40 = vector.extract_strided_slice %29 {offsets = [0, 64], sizes = [16, 8], strides = [1, 1]} : vector<16x96xf32> to vector<16x8xf32>
    %41 = vector.extract_strided_slice %29 {offsets = [0, 72], sizes = [16, 8], strides = [1, 1]} : vector<16x96xf32> to vector<16x8xf32>
    %42 = vector.extract_strided_slice %29 {offsets = [0, 80], sizes = [16, 8], strides = [1, 1]} : vector<16x96xf32> to vector<16x8xf32>
    %43 = vector.extract_strided_slice %29 {offsets = [0, 88], sizes = [16, 8], strides = [1, 1]} : vector<16x96xf32> to vector<16x8xf32>
    %44 = tpu.concatenate %40, %41, %42, %43 in 0 : vector<16x8xf32>, vector<16x8xf32>, vector<16x8xf32>, vector<16x8xf32> -> vector<64x8xf32>
    "tpu.trace_start"() <{level = 10 : i32, message = "nd,md->nm"}> : () -> ()
    %cst_16 = arith.constant dense<0.000000e+00> : vector<64x64xf32>
    %45 = tpu.matmul %34, %39, %cst_16 {dimension_numbers = #tpu.dot_dimension_numbers<[1], [1], [0], [0], [0, 0, 1, 0], [], []>} : vector<64x8xf32>, vector<64x8xf32>, vector<64x64xf32> -> vector<64x64xf32>
    "tpu.trace_stop"() : () -> ()
    %cst_17 = arith.constant 0.353553385 : f32
    %46 = vector.broadcast %cst_17 : f32 to vector<64x64xf32>
    %47 = arith.mulf %45, %46 : vector<64x64xf32>
    %c0_18 = arith.constant 0 : index
    %c0_19 = arith.constant 0 : index
    %48 = vector.load %arg2[%c0_18, %c0_19] : memref<64x64xf32, #tpu.memory_space<vmem>>, vector<64x64xf32>
    %49 = arith.addf %47, %48 : vector<64x64xf32>
    %cst_20 = arith.constant dense<0xFF800000> : vector<64xf32>
    %50 = vector.multi_reduction <maximumf>, %49, %cst_20 [1] : vector<64x64xf32> to vector<64xf32>
    %51 = vector.shape_cast %50 : vector<64xf32> to vector<64x1xf32>
    %52 = vector.broadcast %51 : vector<64x1xf32> to vector<64x64xf32>
    %53 = arith.subf %49, %52 : vector<64x64xf32>
    %54 = math.exp %53 : vector<64x64xf32>
    %cst_21 = arith.constant dense<0.000000e+00> : vector<64xf32>
    %55 = vector.multi_reduction <add>, %54, %cst_21 [1] : vector<64x64xf32> to vector<64xf32>
    %56 = vector.shape_cast %55 : vector<64xf32> to vector<64x1xf32>
    %57 = tpu.reciprocal %56 : vector<64x1xf32> -> vector<64x1xf32>
    %58 = vector.broadcast %57 : vector<64x1xf32> to vector<64x64xf32>
    %59 = arith.mulf %54, %58 : vector<64x64xf32>
    %cst_22 = arith.constant dense<0.000000e+00> : vector<64x8xf32>
    %60 = tpu.matmul %59, %44, %cst_22 {dimension_numbers = #tpu.dot_dimension_numbers<[1], [0], [0], [1], [0, 0, 1, 1], [], []>} : vector<64x64xf32>, vector<64x8xf32>, vector<64x8xf32> -> vector<64x8xf32>
    %c0_23 = arith.constant 0 : index
    %c0_24 = arith.constant 0 : index
    %61 = vector.load %arg5[%c0_23, %c0_24] : memref<32x32xf32, #tpu.memory_space<vmem>>, vector<32x32xf32>
    %62 = vector.extract_strided_slice %60 {offsets = [0, 0], sizes = [16, 8], strides = [1, 1]} : vector<64x8xf32> to vector<16x8xf32>
    %63 = vector.extract_strided_slice %61 {offsets = [0, 0], sizes = [8, 32], strides = [1, 1]} : vector<32x32xf32> to vector<8x32xf32>
    %cst_25 = arith.constant dense<0.000000e+00> : vector<16x32xf32>
    %64 = tpu.matmul %62, %63, %cst_25 {dimension_numbers = #tpu.dot_dimension_numbers<[1], [0], [0], [1], [0, 0, 1, 1], [], []>} : vector<16x8xf32>, vector<8x32xf32>, vector<16x32xf32> -> vector<16x32xf32>
    %65 = vector.extract_strided_slice %60 {offsets = [16, 0], sizes = [16, 8], strides = [1, 1]} : vector<64x8xf32> to vector<16x8xf32>
    %66 = vector.extract_strided_slice %61 {offsets = [8, 0], sizes = [8, 32], strides = [1, 1]} : vector<32x32xf32> to vector<8x32xf32>
    %cst_26 = arith.constant dense<0.000000e+00> : vector<16x32xf32>
    %67 = tpu.matmul %65, %66, %cst_26 {dimension_numbers = #tpu.dot_dimension_numbers<[1], [0], [0], [1], [0, 0, 1, 1], [], []>} : vector<16x8xf32>, vector<8x32xf32>, vector<16x32xf32> -> vector<16x32xf32>
    %68 = arith.addf %64, %67 : vector<16x32xf32>
    %69 = vector.extract_strided_slice %60 {offsets = [32, 0], sizes = [16, 8], strides = [1, 1]} : vector<64x8xf32> to vector<16x8xf32>
    %70 = vector.extract_strided_slice %61 {offsets = [16, 0], sizes = [8, 32], strides = [1, 1]} : vector<32x32xf32> to vector<8x32xf32>
    %cst_27 = arith.constant dense<0.000000e+00> : vector<16x32xf32>
    %71 = tpu.matmul %69, %70, %cst_27 {dimension_numbers = #tpu.dot_dimension_numbers<[1], [0], [0], [1], [0, 0, 1, 1], [], []>} : vector<16x8xf32>, vector<8x32xf32>, vector<16x32xf32> -> vector<16x32xf32>
    %72 = arith.addf %68, %71 : vector<16x32xf32>
    %73 = vector.extract_strided_slice %60 {offsets = [48, 0], sizes = [16, 8], strides = [1, 1]} : vector<64x8xf32> to vector<16x8xf32>
    %74 = vector.extract_strided_slice %61 {offsets = [24, 0], sizes = [8, 32], strides = [1, 1]} : vector<32x32xf32> to vector<8x32xf32>
    %cst_28 = arith.constant dense<0.000000e+00> : vector<16x32xf32>
    %75 = tpu.matmul %73, %74, %cst_28 {dimension_numbers = #tpu.dot_dimension_numbers<[1], [0], [0], [1], [0, 0, 1, 1], [], []>} : vector<16x8xf32>, vector<8x32xf32>, vector<16x32xf32> -> vector<16x32xf32>
    %76 = arith.addf %72, %75 : vector<16x32xf32>
    %c0_29 = arith.constant 0 : index
    %c0_30 = arith.constant 0 : index
    %77 = vector.load %arg6[%c0_29, %c0_30] : memref<1x32xf32, #tpu.memory_space<vmem>>, vector<1x32xf32>
    %78 = vector.broadcast %77 : vector<1x32xf32> to vector<16x32xf32>
    %79 = arith.addf %76, %78 : vector<16x32xf32>
    %80 = arith.addf %24, %79 : vector<16x32xf32>
    %c0_31 = arith.constant 0 : index
    %c0_32 = arith.constant 0 : index
    %81 = vector.load %arg9[%c0_31, %c0_32] : memref<1x32xf32, #tpu.memory_space<vmem>>, vector<1x32xf32>
    %c0_33 = arith.constant 0 : index
    %c0_34 = arith.constant 0 : index
    %82 = vector.load %arg10[%c0_33, %c0_34] : memref<1x32xf32, #tpu.memory_space<vmem>>, vector<1x32xf32>
    %cst_35 = arith.constant dense<0.000000e+00> : vector<16xf32>
    %83 = vector.multi_reduction <add>, %80, %cst_35 [1] : vector<16x32xf32> to vector<16xf32>
    %84 = vector.shape_cast %83 : vector<16xf32> to vector<16x1xf32>
    %cst_36 = arith.constant 3.200000e+01 : f32
    %85 = vector.broadcast %cst_36 : f32 to vector<16x1xf32>
    %86 = arith.divf %84, %85 : vector<16x1xf32>
    %87 = vector.broadcast %86 : vector<16x1xf32> to vector<16x32xf32>
    %88 = arith.subf %80, %87 : vector<16x32xf32>
    %89 = arith.mulf %88, %88 : vector<16x32xf32>
    %cst_37 = arith.constant dense<0.000000e+00> : vector<16xf32>
    %90 = vector.multi_reduction <add>, %89, %cst_37 [1] : vector<16x32xf32> to vector<16xf32>
    %91 = vector.shape_cast %90 : vector<16xf32> to vector<16x1xf32>
    %cst_38 = arith.constant 3.100000e+01 : f32
    %92 = vector.broadcast %cst_38 : f32 to vector<16x1xf32>
    %93 = arith.divf %91, %92 : vector<16x1xf32>
    %94 = math.sqrt %93 : vector<16x1xf32>
    %cst_39 = arith.constant 9.99999997E-7 : f32
    %95 = vector.broadcast %cst_39 : f32 to vector<16x1xf32>
    %96 = arith.addf %94, %95 : vector<16x1xf32>
    %97 = tpu.reciprocal %96 : vector<16x1xf32> -> vector<16x1xf32>
    %98 = vector.broadcast %81 : vector<1x32xf32> to vector<16x32xf32>
    %99 = arith.mulf %98, %88 : vector<16x32xf32>
    %100 = vector.broadcast %97 : vector<16x1xf32> to vector<16x32xf32>
    %101 = arith.mulf %99, %100 : vector<16x32xf32>
    %102 = vector.broadcast %82 : vector<1x32xf32> to vector<16x32xf32>
    %103 = arith.addf %101, %102 : vector<16x32xf32>
    %c0_40 = arith.constant 0 : index
    %c0_41 = arith.constant 0 : index
    %104 = vector.load %arg11[%c0_40, %c0_41] : memref<32x512xf32, #tpu.memory_space<vmem>>, vector<32x512xf32>
    %cst_42 = arith.constant dense<0.000000e+00> : vector<16x512xf32>
    %105 = tpu.matmul %103, %104, %cst_42 {dimension_numbers = #tpu.dot_dimension_numbers<[1], [0], [0], [1], [0, 0, 1, 1], [], []>} : vector<16x32xf32>, vector<32x512xf32>, vector<16x512xf32> -> vector<16x512xf32>
    %c0_43 = arith.constant 0 : index
    %c0_44 = arith.constant 0 : index
    %106 = vector.load %arg12[%c0_43, %c0_44] : memref<1x512xf32, #tpu.memory_space<vmem>>, vector<1x512xf32>
    %107 = vector.broadcast %106 : vector<1x512xf32> to vector<16x512xf32>
    %108 = arith.addf %105, %107 : vector<16x512xf32>
    %cst_45 = arith.constant 0.000000e+00 : f32
    %109 = vector.broadcast %cst_45 : f32 to vector<16x512xf32>
    %110 = arith.maximumf %108, %109 : vector<16x512xf32>
    %c0_46 = arith.constant 0 : index
    %c0_47 = arith.constant 0 : index
    %111 = vector.load %arg13[%c0_46, %c0_47] : memref<512x32xf32, #tpu.memory_space<vmem>>, vector<512x32xf32>
    %cst_48 = arith.constant dense<0.000000e+00> : vector<16x32xf32>
    %112 = tpu.matmul %110, %111, %cst_48 {dimension_numbers = #tpu.dot_dimension_numbers<[1], [0], [0], [1], [0, 0, 1, 1], [], []>} : vector<16x512xf32>, vector<512x32xf32>, vector<16x32xf32> -> vector<16x32xf32>
    %c0_49 = arith.constant 0 : index
    %c0_50 = arith.constant 0 : index
    %113 = vector.load %arg14[%c0_49, %c0_50] : memref<1x32xf32, #tpu.memory_space<vmem>>, vector<1x32xf32>
    %114 = vector.broadcast %113 : vector<1x32xf32> to vector<16x32xf32>
    %115 = arith.addf %112, %114 : vector<16x32xf32>
    %116 = arith.addf %80, %115 : vector<16x32xf32>
    %c0_51 = arith.constant 0 : index
    %c0_52 = arith.constant 0 : index
    %117 = vector.load %arg18[%c0_51, %c0_52] : memref<16x32xf32, #tpu.memory_space<vmem>>, vector<16x32xf32>
    tpu.vector_store %arg18[%c0_51, %c0_52], %116 {strides = array<i32>} : memref<16x32xf32, #tpu.memory_space<vmem>>, vector<16x32xf32>,
    %c0_53 = arith.constant 0 : index
    %c0_54 = arith.constant 0 : index
    %118 = vector.load %arg15[%c0_53, %c0_54] : memref<32x16xf32, #tpu.memory_space<vmem>>, vector<32x16xf32>
    %cst_55 = arith.constant dense<0.000000e+00> : vector<16x16xf32>
    %119 = tpu.matmul %116, %118, %cst_55 {dimension_numbers = #tpu.dot_dimension_numbers<[1], [0], [0], [1], [0, 0, 1, 1], [], []>} : vector<16x32xf32>, vector<32x16xf32>, vector<16x16xf32> -> vector<16x16xf32>
    %c0_56 = arith.constant 0 : index
    %c0_57 = arith.constant 0 : index
    %120 = vector.load %arg16[%c0_56, %c0_57] : memref<16x16xf32, #tpu.memory_space<vmem>>, vector<16x16xf32>
    %cst_58 = arith.constant dense<0.000000e+00> : vector<16x16xf32>
    %121 = tpu.matmul %1, %120, %cst_58 {dimension_numbers = #tpu.dot_dimension_numbers<[1], [0], [0], [1], [0, 0, 1, 1], [], []>} : vector<16x16xf32>, vector<16x16xf32>, vector<16x16xf32> -> vector<16x16xf32>
    %122 = arith.addf %119, %121 : vector<16x16xf32>
    %c0_59 = arith.constant 0 : index
    %c0_60 = arith.constant 0 : index
    %123 = vector.load %arg17[%c0_59, %c0_60] : memref<1x16xf32, #tpu.memory_space<vmem>>, vector<1x16xf32>
    %124 = vector.broadcast %123 : vector<1x16xf32> to vector<16x16xf32>
    %125 = arith.addf %122, %124 : vector<16x16xf32>
    %c0_61 = arith.constant 0 : index
    %c0_62 = arith.constant 0 : index
    %126 = vector.load %arg19[%c0_61, %c0_62] : memref<16x16xf32, #tpu.memory_space<vmem>>, vector<16x16xf32>
    tpu.vector_store %arg19[%c0_61, %c0_62], %125 {strides = array<i32>} : memref<16x16xf32, #tpu.memory_space<vmem>>, vector<16x16xf32>,
    return
  }
}

</mosaic_0001>

<bundles_post_ra>
// kernel: tpu_custom_call.1
= control target key start
LH: loop header
LB: loop body
LE: loop exit
PB: predicated region body
PF: predicated region fallthrough
CT: control target
= control target key end

     0   :  { %s2928_s0 = inlined_call_operand.vmem [shape: f32[16,32], index: 0, kind: input, shape index: {}]   ;;  %s2929_s1 = inlined_call_operand.vmem [shape: f32[16,16], index: 1, kind: input, shape index: {}]   ;;  %s2930_s2 = inlined_call_operand.vmem [shape: f32[64,64], index: 2, kind: input, shape index: {}]   ;;  %s2931_s3 = inlined_call_operand.vmem [shape: f32[32,96], index: 3, kind: input, shape index: {}]   ;;  %s2932_s4 = inlined_call_operand.vmem [shape: f32[1,96], index: 4, kind: input, shape index: {}]   ;;  %s2933_s5 = inlined_call_operand.vmem [shape: f32[32,32], index: 5, kind: input, shape index: {}]   ;;  %s2934_s6 = inlined_call_operand.vmem [shape: f32[1,32], index: 6, kind: input, shape index: {}]   ;;  %s2935_s7 = inlined_call_operand.vmem [shape: f32[1,32], index: 7, kind: input, shape index: {}]   ;;  %s2936_s8 = inlined_call_operand.vmem [shape: f32[1,32], index: 8, kind: input, shape index: {}]   ;;  %s2937_s9 = inlined_call_operand.vmem [shape: f32[1,32], index: 9, kind: input, shape index: {}]   ;;  %s2938_s10 = inlined_call_operand.vmem [shape: f32[1,32], index: 10, kind: input, shape index: {}]   ;;  %s2939_s11 = inlined_call_operand.vmem [shape: f32[32,512], index: 11, kind: input, shape index: {}]   ;;  %s2940_s12 = inlined_call_operand.vmem [shape: f32[1,512], index: 12, kind: input, shape index: {}]   ;;  %s2941_s13 = inlined_call_operand.vmem [shape: f32[512,32], index: 13, kind: input, shape index: {}]   ;;  %s2942_s14 = inlined_call_operand.vmem [shape: f32[1,32], index: 14, kind: input, shape index: {}]   ;;  %s2943_s15 = inlined_call_operand.vmem [shape: f32[32,16], index: 15, kind: input, shape index: {}]   ;;  %s2944_s16 = inlined_call_operand.vmem [shape: f32[16,16], index: 16, kind: input, shape index: {}]   ;;  %s2945_s17 = inlined_call_operand.vmem [shape: f32[1,16], index: 17, kind: input, shape index: {}]   ;;  %s2946_s18 = inlined_call_operand.hbm [shape: f32[16,32], index: 18, kind: output, shape index: {0}]   ;;  %s2947_s19 = inlined_call_operand.hbm [shape: f32[16,16], index: 19, kind: output, shape index: {1}]  }
   0x1   :  { %2952 = sst [smem:[#allocation8_spill]] %s2928_s0 }
   0x2   :  { %2953 = sst [smem:[#allocation9_spill]] %s2929_s1 }
   0x3   :  { %2954 = sst [smem:[#allocation10_spill]] %s2930_s2 }
   0x4   :  { %2955 = sst [smem:[#allocation11_spill]] %s2931_s3 }
   0x5   :  { %25 = vsyncpa [#allocation3], 0  ;;  %s2956_s20 = sld [smem:[#allocation8_spill]]  ;;  %vm69_vm0 = vcmask 261120  }
   0xb   :  { %v63_v0 = vld [vmem:[%s2956_s20] sm:$0xff]  ;;  %v64_v1 = vld [vmem:[%s2956_s20 + $0x8] sm:$0xff] }
   0xc   :  { %v70_v2 = vsel %vm69_vm0, %v63_v0, 0.0 }
   0xd   :  { %26 = vsyncpa [#allocation5], 0  ;;  %71 = vadd.xlane.f32.xlu0 %v70_v2  ;;  %v73_v3 = vsel %vm69_vm0, %v64_v1, 0.0  ;;  %s2957_s23 = sld [smem:[#allocation11_spill]]  ;;  %v1698_v36 = vld [vmem:[%s2935_s7] ss:$0 sm:$0xff] }
   0xe   :  { %v1699_v39 = vld [vmem:[%s2936_s8] ss:$0 sm:$0xff]  ;;  %vm250_vm5 = vcmask 64512   ;;  %s2283_s8 = smov 120   ;;  %s2284_s1 = smov 112   ;;  %vm412_vm7 = vcmask 523264  }
   0xf   :  { %v1700_v46 = vld [vmem:[%s2932_s4] ss:$0 sm:$0xff]  ;;  %s2285_s22 = smov 104   ;;  %s2286_s2 = smov 96   ;;  %vm2444_vm6 = vmpackc.low %vm250_vm5, %vm250_vm5  ;;  %vm1492_vm12 = vcmask 130048  }
  0x10   :  { %s2960_s24 = sld [smem:[#allocation10_spill]]  ;;  %s2961_s21 = sld [smem:[#allocation9_spill]] }
  0x11   :  { %74 = vadd.xlane.f32.xlu0 %v73_v3 }
  0x13   :  { %v128_v14 = vld [vmem:[%s2957_s23] sm:$0xff]  ;;  %v129_v15 = vld [vmem:[%s2957_s23 + $0x8] sm:$0xff]  ;;  %v130_v16 = vld [vmem:[%s2957_s23 + $0x10] sm:$0xff] }
  0x14   :  { %v1989_v17 = vpack.c.bf16 %v129_v15, %v128_v14  ;;  %v131_v18 = vld [vmem:[%s2957_s23 + $0x18] sm:$0xff] }
  0x15   :  { %v1993_v19 = vpack.c.bf16 %v131_v18, %v130_v16 }
  0x16   :  { %1990 = vmatprep.subr.bf16.mxu0 %v1989_v17  ;;  %v397_v15 = vld [vmem:[%s2960_s24 + $0x8] sm:$0xff]  ;;  %v396_v18 = vld [vmem:[%s2960_s24] sm:$0xff] }
  0x17   :  { %1992 = vmatpush3.bf16.msra.mxu0 %v1989_v17 }
  0x18   :  { %1994 = vmatprep.subr.bf16.mxu0 %v1993_v19 }
  0x1b   :  { %1996 = vmatpush3.bf16.msra.mxu0 %v1993_v19 }
  0x9a   :  { %v72_v4 = vpop.xlane.xlu0 %71 }
  0x9b   :  { %v77_v5 = vmul.f32 0.03125, %v72_v4 }
  0x9d   :  { %v79_v6 = vsub.f32 %v63_v0, %v77_v5 }
  0x9e   :  { %v75_v7 = vpop.xlane.xlu0 %74 }
  0x9f   :  { %v78_v8 = vmul.f32 0.03125, %v75_v7  ;;  %v81_v9 = vmul.f32 %v79_v6, %v79_v6  ;;  %v116_v37 = vmul.f32 %v1698_v36, %v79_v6 }
  0xa1   :  { %v80_v10 = vsub.f32 %v64_v1, %v78_v8  ;;  %v83_v11 = vsel %vm69_vm0, %v81_v9, 0.0 }
  0xa2   :  { %84 = vadd.xlane.f32.xlu1 %v83_v11 }
  0xa3   :  { %v82_v12 = vmul.f32 %v80_v10, %v80_v10  ;;  %v117_v41 = vmul.f32 %v1698_v36, %v80_v10 }
  0xa5   :  { %v86_v13 = vsel %vm69_vm0, %v82_v12, 0.0 }
  0xa6   :  { %87 = vadd.xlane.f32.xlu1 %v86_v13 }
 0x12f   :  { %v85_v20 = vpop.xlane.xlu1 %84 }
 0x130   :  { %v90_v21 = vmul.f32 0.032258064, %v85_v20 }
 0x132   :  { %2187 = vrsqrt.f32 %v90_v21  ;;  %vm94_vm1 = vcmp.eq.f32.partialorder %v90_v21, inf  ;;  %v97_v26 = vand.u32 2147483648, %v90_v21  ;;  %vm96_vm2 = vcmp.eq.f32.partialorder %v90_v21, 0.0 }
 0x133   :  { %v88_v22 = vpop.xlane.xlu1 %87 }
 0x134   :  { %v91_v23 = vmul.f32 0.032258064, %v88_v22 }
 0x136   :  { %2189 = vrsqrt.f32 %v91_v23  ;;  %vm101_vm3 = vcmp.eq.f32.partialorder %v91_v23, inf  ;;  %v104_v32 = vand.u32 2147483648, %v91_v23  ;;  %vm103_vm4 = vcmp.eq.f32.partialorder %v91_v23, 0.0 }
 0x13c   :  { %v2188_v24 = vpop.eup %2187 }
 0x13d   :  { %v93_v25 = vmul.f32 %v2188_v24, %v90_v21 }
 0x13f   :  { %v95_v27 = vsel %vm94_vm1, %v90_v21, %v93_v25  ;;  %v398_v25 = vld [vmem:[%s2960_s24 + $0x10] sm:$0xff] }
 0x140   :  { %v2190_v28 = vpop.eup %2189  ;;  %v98_v29 = vsel %vm96_vm2, %v97_v26, %v95_v27 }
 0x141   :  { %v100_v30 = vmul.f32 %v2190_v28, %v91_v23  ;;  %v106_v31 = vadd.f32 1e-06, %v98_v29  ;;  %v399_v29 = vld [vmem:[%s2960_s24 + $0x18] sm:$0xff] }
 0x143   :  { %v102_v33 = vsel %vm101_vm3, %v91_v23, %v100_v30  ;;  %2191 = vrcp.f32 %v106_v31 }
 0x144   :  { %v105_v34 = vsel %vm103_vm4, %v104_v32, %v102_v33  ;;  %v401_v32 = vld [vmem:[%s2960_s24 + $0x28] sm:$0xff] }
 0x145   :  { %v107_v35 = vadd.f32 1e-06, %v105_v34 }
 0x147   :  { %2193 = vrcp.f32 %v107_v35 }
 0x14d   :  { %v2192_v38 = vpop.eup %2191 }
 0x14e   :  { %v118_v40 = vmul.f32 %v2192_v38, %v116_v37 }
 0x150   :  { %v2421_v42 = vadd.f32 %v1699_v39, %v118_v40 }
 0x151   :  { %v2194_v43 = vpop.eup %2193 }
 0x152   :  { %v119_v44 = vmul.f32 %v2194_v43, %v117_v41  ;;  %1892 = vmatprep.mubr.msk.f32.mxu0 %vm69_vm0, %v2421_v42  ;;  %v403_v41 = vld [vmem:[%s2960_s24 + $0x38] sm:$0xff] }
 0x154   :  { %v2425_v45 = vadd.f32 %v1699_v39, %v119_v44  ;;  %v400_v39 = vld [vmem:[%s2960_s24 + $0x20] sm:$0xff] }
 0x156   :  { %1893 = vmatmul.mubr.msk.f32.vlgmr.msra.gmra.mrb[0].mxu0 %vm69_vm0, %v2425_v45 }
 0x229   :  { %v1894_v47 = vpop.f32.mrb[0].mxu0 }
 0x22a   :  { %v217_v48 = vadd.f32 %v1894_v47, %v1700_v46  ;;  %v211_v49 = vpop.f32.mrb[1].mxu0 }
 0x22b   :  { %v212_v50 = vadd.f32 %v1700_v46, %v211_v49 }
 0x22c   :  { %224 = vrot.lane.b32.xlu1 %v217_v48, %s2283_s8 }
 0x22d   :  { %222 = vrot.lane.b32.xlu0 %v212_v50, %s2283_s8  ;;  %1911 = vmatprep.mubr.msk.f32.mxu1 %vm250_vm5, %v212_v50  ;;  %v2433_v51 = vpack.i.bf16 %v217_v48, %v212_v50 }
 0x230   :  { %226 = vrot.lane.b32.xlu1 %v212_v50, %s2284_s1 }
 0x231   :  { %230 = vrot.lane.b32.xlu0 %v212_v50, %s2285_s22 }
 0x234   :  { %228 = vrot.lane.b32.xlu1 %v217_v48, %s2284_s1 }
 0x235   :  { %2148 = vrot.lane.b32.xlu0 %v2433_v51, %s2286_s2 }
 0x238   :  { %232 = vrot.lane.b32.xlu1 %v217_v48, %s2285_s22 }
 0x29e   :  { %v225_v52 = vpop.permute.xlu1 %224 }
 0x29f   :  { %v223_v53 = vpop.permute.xlu0 %222 }
 0x2a0   :  { %v2436_v54 = vpack.i.bf16 %v225_v52, %v223_v53 }
 0x2a2   :  { %v227_v55 = vpop.permute.xlu1 %226  ;;  %2153 = vrot.lane.b32.xlu1 %v2436_v54, %s2286_s2 }
 0x2a3   :  { %v231_v56 = vpop.permute.xlu0 %230 }
 0x2a6   :  { %v229_v57 = vpop.permute.xlu1 %228 }
 0x2a7   :  { %v2439_v58 = vpack.i.bf16 %v229_v57, %v227_v55  ;;  %v2149_v59 = vpop.permute.xlu0 %2148 }
 0x2a8   :  { %v2151_v60 = vunpack.i.h.bf16 %v2149_v59  ;;  %v2150_v61 = vunpack.i.l.bf16 %v2149_v59 }
 0x2a9   :  { %2158 = vrot.lane.b32.xlu0 %v2439_v58, %s2286_s2 }
 0x2aa   :  { %v233_v63 = vpop.permute.xlu1 %232  ;;  %v1997_v0 = vpack.c.bf16 %v2151_v60, %v2150_v61 }
 0x2ab   :  { %v2448_v1 = vpack.i.bf16 %v233_v63, %v231_v56 }
 0x2ac   :  { %1999 = vmatprep.subr.msk.bf16.mxu1 %vm2444_vm6, %v1997_v0 }
 0x2ad   :  { %2163 = vrot.lane.b32.xlu1 %v2448_v1, %s2286_s2  ;;  %2002 = vmatpush3.bf16.xpose.msk.msra.mxu1 %vm2444_vm6, %v1997_v0  ;;  %s2287_s2 = smov 64  }
 0x314   :  { %v2154_v2 = vpop.permute.xlu1 %2153 }
 0x315   :  { %v2156_v3 = vunpack.i.h.bf16 %v2154_v2  ;;  %v2155_v4 = vunpack.i.l.bf16 %v2154_v2 }
 0x317   :  { %v2003_v5 = vpack.c.bf16 %v2156_v3, %v2155_v4 }
 0x319   :  { %2005 = vmatprep.subr.msk.bf16.mxu1 %vm2444_vm6, %v2003_v5 }
 0x31a   :  { %2008 = vmatpush3.bf16.xpose.msk.msra.mxu1 %vm2444_vm6, %v2003_v5 }
 0x31b   :  { %v2159_v6 = vpop.permute.xlu0 %2158 }
 0x31c   :  { %v2161_v7 = vunpack.i.h.bf16 %v2159_v6  ;;  %v2160_v8 = vunpack.i.l.bf16 %v2159_v6 }
 0x31e   :  { %v2009_v9 = vpack.c.bf16 %v2161_v7, %v2160_v8 }
 0x31f   :  { %v2164_v10 = vpop.permute.xlu1 %2163 }
 0x320   :  { %v2166_v11 = vunpack.i.h.bf16 %v2164_v10  ;;  %v2165_v12 = vunpack.i.l.bf16 %v2164_v10  ;;  %2011 = vmatprep.subr.msk.bf16.mxu1 %vm2444_vm6, %v2009_v9 }
 0x322   :  { %v2015_v13 = vpack.c.bf16 %v2166_v11, %v2165_v12  ;;  %2014 = vmatpush3.bf16.xpose.msk.msra.mxu1 %vm2444_vm6, %v2009_v9 }
 0x324   :  { %2017 = vmatprep.subr.msk.bf16.mxu1 %vm2444_vm6, %v2015_v13 }
 0x32a   :  { %2020 = vmatpush3.bf16.xpose.msk.msra.mxu1 %vm2444_vm6, %v2015_v13 }
 0x331   :  { %1912 = vmatmul.mubr.msk.f32.vlgmr.msra.gmra.mrb[0].mxu1 %vm250_vm5, %v217_v48 }
 0x332   :  { %1914 = vmatprep.mubr.msk.f32.mxu1 %vm250_vm5, %v223_v53 }
 0x335   :  { %1915 = vmatmul.mubr.msk.f32.gmra.mrb[2].mxu1 %vm250_vm5, %v225_v52  ;;  %v402_v52 = vld [vmem:[%s2960_s24 + $0x30] sm:$0xff] }
 0x336   :  { %1917 = vmatprep.mubr.msk.f32.mxu1 %vm250_vm5, %v227_v55 }
 0x339   :  { %1918 = vmatmul.mubr.msk.f32.gmra.mrb[4].mxu1 %vm250_vm5, %v229_v57 }
 0x33a   :  { %1920 = vmatprep.mubr.msk.f32.mxu1 %vm250_vm5, %v231_v56 }
 0x33d   :  { %1921 = vmatmul.mubr.msk.f32.gmra.mrb[6].mxu1 %vm250_vm5, %v233_v63 }
 0x404   :  { %v1913_v14 = vpop.f32.mrb[0].mxu1 }
 0x405   :  { %v389_v16 = vmul.f32 0.35355338, %v1913_v14  ;;  %v349_v17 = vpop.f32.mrb[1].mxu1 }
 0x406   :  { %v388_v19 = vmul.f32 0.35355338, %v349_v17 }
 0x407   :  { %v405_v20 = vadd.f32 %v397_v15, %v389_v16 }
 0x408   :  { %v1916_v21 = vpop.f32.mrb[2].mxu1  ;;  %v404_v22 = vadd.f32 %v396_v18, %v388_v19 }
 0x409   :  { %v359_v23 = vpop.f32.mrb[3].mxu1  ;;  %v416_v24 = vsel %vm412_vm7, %v405_v20, -inf  ;;  %v391_v26 = vmul.f32 0.35355338, %v1916_v21 }
 0x40a   :  { %v390_v27 = vmul.f32 0.35355338, %v359_v23  ;;  %417 = vmax.xlane.f32.xlu1 %v416_v24  ;;  %v413_v28 = vsel %vm412_vm7, %v404_v22, -inf }
 0x40b   :  { %414 = vmax.xlane.f32.xlu0 %v413_v28  ;;  %v407_v37 = vadd.f32 %v399_v29, %v391_v26 }
 0x40c   :  { %v1919_v30 = vpop.f32.mrb[4].mxu1  ;;  %v406_v31 = vadd.f32 %v398_v25, %v390_v27 }
 0x40d   :  { %v393_v33 = vmul.f32 0.35355338, %v1919_v30  ;;  %v369_v34 = vpop.f32.mrb[5].mxu1  ;;  %v422_v48 = vsel %vm412_vm7, %v407_v37, -inf }
 0x40e   :  { %v392_v35 = vmul.f32 0.35355338, %v369_v34  ;;  %v419_v36 = vsel %vm412_vm7, %v406_v31, -inf }
 0x40f   :  { %420 = vmax.xlane.f32.xlu0 %v419_v36  ;;  %v409_v38 = vadd.f32 %v401_v32, %v393_v33 }
 0x410   :  { %v1922_v40 = vpop.f32.mrb[6].mxu1  ;;  %v2500_v49 = vadd.f32 %v400_v39, %v392_v35 }
 0x411   :  { %v395_v43 = vmul.f32 0.35355338, %v1922_v40  ;;  %v379_v44 = vpop.f32.mrb[7].mxu1  ;;  %v428_v46 = vsel %vm412_vm7, %v409_v38, -inf }
 0x412   :  { %v394_v47 = vmul.f32 0.35355338, %v379_v44  ;;  %429 = vmax.xlane.f32.xlu1 %v428_v46  ;;  %v425_v55 = vsel %vm412_vm7, %v2500_v49, -inf }
 0x413   :  { %423 = vmax.xlane.f32.xlu0 %v422_v48  ;;  %v2502_v50 = vadd.f32 %v403_v41, %v395_v43 }
 0x414   :  { %v2511_v56 = vadd.f32 %v402_v52, %v394_v47 }
 0x415   :  { %v434_v53 = vsel %vm412_vm7, %v2502_v50, -inf }
 0x416   :  { %435 = vmax.xlane.f32.xlu1 %v434_v53  ;;  %v431_v57 = vsel %vm412_vm7, %v2511_v56, -inf }
 0x417   :  { %426 = vmax.xlane.f32.xlu0 %v425_v55 }
 0x41b   :  { %432 = vmax.xlane.f32.xlu0 %v431_v57 }
 0x427   :  { %2173 = vrot.lane.b32.xlu1 %v2436_v54, %s2287_s2 }
 0x431   :  { %2168 = vrot.lane.b32.xlu0 %v2433_v51, %s2287_s2 }
 0x497   :  { %v418_v59 = vpop.xlane.xlu1 %417 }
 0x498   :  { %v438_v60 = vsub.f32 %v405_v20, %v418_v59  ;;  %v415_v61 = vpop.xlane.xlu0 %414 }
 0x499   :  { %v437_v62 = vsub.f32 %v404_v22, %v415_v61 }
 0x49a   :  { %v447_v63 = vmul.f32 1.442695, %v438_v60 }
 0x49b   :  { %v445_v0 = vmul.f32 1.442695, %v437_v62 }
 0x49c   :  { %2195 = vpow2.f32 %v447_v63  ;;  %v421_v2 = vpop.xlane.xlu0 %420 }
 0x49d   :  { %2197 = vpow2.f32 %v445_v0  ;;  %v439_v3 = vsub.f32 %v406_v31, %v421_v2 }
 0x49f   :  { %v449_v4 = vmul.f32 1.442695, %v439_v3  ;;  %v430_v5 = vpop.xlane.xlu1 %429 }
 0x4a0   :  { %v442_v6 = vsub.f32 %v409_v38, %v430_v5  ;;  %v424_v7 = vpop.xlane.xlu0 %423 }
 0x4a1   :  { %2199 = vpow2.f32 %v449_v4  ;;  %v440_v8 = vsub.f32 %v407_v37, %v424_v7 }
 0x4a2   :  { %v455_v54 = vmul.f32 1.442695, %v442_v6 }
 0x4a3   :  { %v451_v9 = vmul.f32 1.442695, %v440_v8  ;;  %v436_v10 = vpop.xlane.xlu1 %435 }
 0x4a4   :  { %2201 = vpow2.f32 %v455_v54  ;;  %v427_v51 = vpop.xlane.xlu0 %426  ;;  %v444_v33 = vsub.f32 %v2502_v50, %v436_v10 }
 0x4a5   :  { %2203 = vpow2.f32 %v451_v9  ;;  %v441_v30 = vsub.f32 %v2500_v49, %v427_v51 }
 0x4a6   :  { %v2519_v11 = vpop.eup %2195  ;;  %v459_v35 = vmul.f32 1.442695, %v444_v33 }
 0x4a7   :  { %v2198_v12 = vpop.eup %2197  ;;  %v464_v13 = vsel %vm412_vm7, %v2519_v11, 0.0  ;;  %v2174_v17 = vpop.permute.xlu1 %2173  ;;  %v453_v31 = vmul.f32 1.442695, %v441_v30 }
 0x4a8   :  { %465 = vadd.xlane.f32.xlu1 %v464_v13  ;;  %v433_v14 = vpop.xlane.xlu0 %432  ;;  %v461_v15 = vsel %vm412_vm7, %v2198_v12, 0.0  ;;  %v2176_v23 = vunpack.i.h.bf16 %v2174_v17  ;;  %v2175_v24 = vunpack.i.l.bf16 %v2174_v17  ;;  %v654_v13 = vld [vmem:[%s2933_s5] sm:$0xff] }
 0x4a9   :  { %462 = vadd.xlane.f32.xlu0 %v461_v15  ;;  %v443_v32 = vsub.f32 %v2511_v56, %v433_v14  ;;  %2205 = vpow2.f32 %v453_v31 }
 0x4aa   :  { %v2025_v29 = vpack.c.bf16 %v2176_v23, %v2175_v24  ;;  %v1735_v24 = vld [vmem:[%s2934_s6] ss:$0 sm:$0xff] }
 0x4ab   :  { %v2524_v16 = vpop.eup %2199  ;;  %v457_v34 = vmul.f32 1.442695, %v443_v32 }
 0x4ac   :  { %v2169_v18 = vpop.permute.xlu0 %2168  ;;  %v467_v19 = vsel %vm412_vm7, %v2524_v16, 0.0 }
 0x4ad   :  { %v2171_v20 = vunpack.i.h.bf16 %v2169_v18  ;;  %v2170_v21 = vunpack.i.l.bf16 %v2169_v18  ;;  %468 = vadd.xlane.f32.xlu0 %v467_v19  ;;  %2207 = vpow2.f32 %v457_v34  ;;  %v656_v18 = vld [vmem:[%s2933_s5 + $0x10] sm:$0xff]  ;;  %v657_v19 = vld [vmem:[%s2933_s5 + $0x18] sm:$0xff] }
 0x4ae   :  { %v2528_v22 = vpop.eup %2201  ;;  %2209 = vpow2.f32 %v459_v35 }
 0x4af   :  { %v2204_v25 = vpop.eup %2203  ;;  %v2021_v26 = vpack.c.bf16 %v2171_v20, %v2170_v21  ;;  %v476_v27 = vsel %vm412_vm7, %v2528_v22, 0.0 }
 0x4b0   :  { %v470_v28 = vsel %vm412_vm7, %v2204_v25, 0.0 }
 0x4b1   :  { %471 = vadd.xlane.f32.xlu1 %v470_v28  ;;  %477 = vadd.xlane.f32.xlu0 %v476_v27 }
 0x4b2   :  { %2022 = vmatprep.subr.bf16.mxu0 %v2021_v26 }
 0x4b3   :  { %2024 = vmatpush3.bf16.msra.mxu0 %v2021_v26  ;;  %v2206_v36 = vpop.eup %2205 }
 0x4b4   :  { %2026 = vmatprep.subr.bf16.mxu0 %v2025_v29  ;;  %v473_v37 = vsel %vm412_vm7, %v2206_v36, 0.0 }
 0x4b7   :  { %2028 = vmatpush3.bf16.msra.mxu0 %v2025_v29  ;;  %v2208_v38 = vpop.eup %2207 }
 0x4c2   :  { %2178 = vrot.lane.b32.xlu1 %v2439_v58, %s2287_s2  ;;  %v479_v58 = vsel %vm412_vm7, %v2208_v38, 0.0 }
 0x4c7   :  { %2183 = vrot.lane.b32.xlu0 %v2448_v1, %s2287_s2  ;;  %v2210_v1 = vpop.eup %2209 }
 0x4c8   :  { %v482_v39 = vsel %vm412_vm7, %v2210_v1, 0.0 }
 0x4e6   :  { %474 = vadd.xlane.f32.xlu1 %v473_v37 }
 0x4ea   :  { %480 = vadd.xlane.f32.xlu1 %v479_v58 }
 0x4ee   :  { %483 = vadd.xlane.f32.xlu1 %v482_v39  ;;  %v1056_v39 = vld [vmem:[%s2939_s11 + $0x8] sm:$0xff] }
 0x535   :  { %v466_v41 = vpop.xlane.xlu1 %465 }
 0x536   :  { %v463_v40 = vpop.xlane.xlu0 %462 }
 0x537   :  { %2211 = vrcp.f32 %v463_v40  ;;  %v1060_v40 = vld [vmem:[%s2939_s11 + $0x28] sm:$0xff] }
 0x538   :  { %2213 = vrcp.f32 %v466_v41  ;;  %v1055_v41 = vld [vmem:[%s2939_s11] sm:$0xff] }
 0x53a   :  { %v469_v43 = vpop.xlane.xlu0 %468 }
 0x53b   :  { %2215 = vrcp.f32 %v469_v43  ;;  %v2037_v43 = vpack.c.bf16 %v1060_v40, %v1056_v39 }
 0x53d   :  { %2038 = vmatprep.subr.bf16.mxu1 %v2037_v43 }
 0x53e   :  { %v472_v44 = vpop.xlane.xlu1 %471  ;;  %v478_v46 = vpop.xlane.xlu0 %477 }
 0x53f   :  { %2217 = vrcp.f32 %v472_v44  ;;  %v1059_v44 = vld [vmem:[%s2939_s11 + $0x20] sm:$0xff] }
 0x540   :  { %2219 = vrcp.f32 %v478_v46  ;;  %v1064_v46 = vld [vmem:[%s2939_s11 + $0x48] sm:$0xff] }
 0x541   :  { %v2212_v47 = vpop.eup %2211 }
 0x542   :  { %v2179_v48 = vpop.permute.xlu1 %2178  ;;  %v2184_v49 = vpop.permute.xlu0 %2183  ;;  %v493_v50 = vmul.f32 %v2212_v47, %v2198_v12  ;;  %v655_v12 = vld [vmem:[%s2933_s5 + $0x8] sm:$0xff] }
 0x543   :  { %v2181_v52 = vunpack.i.h.bf16 %v2179_v48  ;;  %v2180_v53 = vunpack.i.l.bf16 %v2179_v48  ;;  %v2186_v55 = vunpack.i.h.bf16 %v2184_v49  ;;  %v2185_v56 = vunpack.i.l.bf16 %v2184_v49  ;;  %v2214_v60 = vpop.eup %2213  ;;  %v1068_v47 = vld [vmem:[%s2939_s11 + $0x68] sm:$0xff] }
 0x544   :  { %1939 = vmatprep.mubr.msk.f32.mxu0 %vm412_vm7, %v493_v50  ;;  %v494_v62 = vmul.f32 %v2214_v60, %v2519_v11  ;;  %v2288_v48 = vmov 0.0   ;;  %v2039_v49 = vpack.c.bf16 %v1059_v44, %v1055_v41  ;;  %v2041_v50 = vpack.c.bf16 %v1068_v47, %v1064_v46  ;;  %v1277_v60 = vld [vmem:[%s2941_s13 + $0x80] sm:$0xff] }
 0x545   :  { %v2029_v57 = vpack.c.bf16 %v2181_v52, %v2180_v53  ;;  %v2033_v59 = vpack.c.bf16 %v2186_v55, %v2185_v56  ;;  %v2216_v61 = vpop.eup %2215  ;;  %1163 = vmatprep.mubr.f32.mxu1 %v2288_v48  ;;  %v1063_v52 = vld [vmem:[%s2939_s11 + $0x40] sm:$0xff]  ;;  %v1058_v55 = vld [vmem:[%s2939_s11 + $0x18] sm:$0xff] }
 0x546   :  { %v495_v0 = vmul.f32 %v2216_v61, %v2524_v16  ;;  %v1067_v53 = vld [vmem:[%s2939_s11 + $0x60] sm:$0xff]  ;;  %v1062_v56 = vld [vmem:[%s2939_s11 + $0x38] sm:$0xff]  ;;  %2040 = vmatpush1.bf16.msra.mxu1 %v2039_v49  ;;  %v1278_v61 = vld [vmem:[%s2941_s13 + $0x88] sm:$0xff] }
 0x547   :  { %2030 = vmatprep.subr.bf16.mxu0 %v2029_v57  ;;  %2042 = vmatprep.subr.bf16.mxu1 %v2041_v50 }
 0x548   :  { %2032 = vmatpush3.bf16.msra.mxu0 %v2029_v57  ;;  %v2043_v57 = vpack.c.bf16 %v1067_v53, %v1063_v52 }
 0x549   :  { %2034 = vmatprep.subr.bf16.mxu0 %v2033_v59  ;;  %v2218_v63 = vpop.eup %2217 }
 0x54a   :  { %v496_v2 = vmul.f32 %v2218_v63, %v2204_v25  ;;  %v2220_v6 = vpop.eup %2219  ;;  %2044 = vmatpush1.bf16.msra.mxu1 %v2043_v57  ;;  %v2053_v63 = vpack.c.bf16 %v1278_v61, %v1277_v60  ;;  %v1057_v57 = vld [vmem:[%s2939_s11 + $0x10] sm:$0xff]  ;;  %v1737_v61 = vld [vmem:[%s2938_s10] ss:$0 sm:$0xff] }
 0x54b   :  { %v498_v54 = vmul.f32 %v2220_v6, %v2528_v22  ;;  %v1263_v6 = vld [vmem:[%s2941_s13 + $0x10] sm:$0xff] }
 0x54c   :  { %2036 = vmatpush3.bf16.msra.mxu0 %v2033_v59  ;;  %v2045_v59 = vpack.c.bf16 %v1062_v56, %v1058_v55  ;;  %v1736_v55 = vld [vmem:[%s2937_s9] ss:$0 sm:$0xff] }
 0x54d   :  { %1951 = vmatprep.subr.mxu0 %v655_v12 }
 0x54e   :  { %2046 = vmatprep.subr.bf16.mxu1 %v2045_v59  ;;  %v1061_v59 = vld [vmem:[%s2939_s11 + $0x30] sm:$0xff] }
 0x54f   :  { %1940 = vmatmul.mubr.msk.f32.vlgmr.msra.gmra.mrb[2].mxu0 %vm412_vm7, %v494_v62  ;;  %v1261_v62 = vld [vmem:[%s2941_s13] sm:$0xff] }
 0x550   :  { %1942 = vmatprep.mubr.msk.f32.mxu0 %vm412_vm7, %v495_v0  ;;  %1952 = vmatpush3.msra.mxu0 %v655_v12  ;;  %v1262_v0 = vld [vmem:[%s2941_s13 + $0x8] sm:$0xff]  ;;  %v1283_v12 = vld [vmem:[%s2941_s13 + $0xb0] sm:$0xff] }
 0x551   :  { %1956 = vmatprep.subr.mxu0 %v654_v13 }
 0x553   :  { %1943 = vmatmul.mubr.msk.f32.gmra.mrb[4].mxu0 %vm412_vm7, %v496_v2  ;;  %v1279_v2 = vld [vmem:[%s2941_s13 + $0x90] sm:$0xff] }
 0x573   :  { %v475_v3 = vpop.xlane.xlu1 %474 }
 0x574   :  { %2221 = vrcp.f32 %v475_v3  ;;  %v1280_v3 = vld [vmem:[%s2941_s13 + $0x98] sm:$0xff] }
 0x577   :  { %v481_v4 = vpop.xlane.xlu1 %480 }
 0x578   :  { %2223 = vrcp.f32 %v481_v4  ;;  %v2055_v4 = vpack.c.bf16 %v1262_v0, %v1261_v62  ;;  %v1066_v62 = vld [vmem:[%s2939_s11 + $0x58] sm:$0xff]  ;;  %v2047_v0 = vpack.c.bf16 %v1061_v59, %v1057_v57  ;;  %v1321_v57 = vld [vmem:[%s2941_s13 + $0x1e0] sm:$0xff]  ;;  %v1322_v59 = vld [vmem:[%s2941_s13 + $0x1e8] sm:$0xff] }
 0x57b   :  { %v484_v5 = vpop.xlane.xlu1 %483 }
 0x57c   :  { %2225 = vrcp.f32 %v484_v5  ;;  %v2057_v5 = vpack.c.bf16 %v1280_v3, %v1279_v2 }
 0x57e   :  { %v2222_v7 = vpop.eup %2221 }
 0x57f   :  { %v497_v8 = vmul.f32 %v2222_v7, %v2206_v36  ;;  %v1264_v7 = vld [vmem:[%s2941_s13 + $0x18] sm:$0xff] }
 0x581   :  { %1945 = vmatprep.mubr.msk.f32.mxu0 %vm412_vm7, %v497_v8  ;;  %v1281_v8 = vld [vmem:[%s2941_s13 + $0xa0] sm:$0xff] }
 0x582   :  { %v2224_v9 = vpop.eup %2223  ;;  %1946 = vmatmul.mubr.msk.f32.gmra.mrb[6].mxu0 %vm412_vm7, %v498_v54  ;;  %v1282_v54 = vld [vmem:[%s2941_s13 + $0xa8] sm:$0xff] }
 0x583   :  { %v499_v51 = vmul.f32 %v2224_v9, %v2208_v38  ;;  %v2059_v9 = vpack.c.bf16 %v1264_v7, %v1263_v6  ;;  %v1069_v6 = vld [vmem:[%s2939_s11 + $0x70] sm:$0xff] }
 0x585   :  { %1948 = vmatprep.mubr.msk.f32.mxu0 %vm412_vm7, %v499_v51  ;;  %v2061_v51 = vpack.c.bf16 %v1282_v54, %v1281_v8  ;;  %v1309_v8 = vld [vmem:[%s2941_s13 + $0x180] sm:$0xff]  ;;  %v1310_v54 = vld [vmem:[%s2941_s13 + $0x188] sm:$0xff] }
 0x586   :  { %v2226_v10 = vpop.eup %2225 }
 0x587   :  { %v500_v11 = vmul.f32 %v2226_v10, %v2210_v1  ;;  %v1265_v10 = vld [vmem:[%s2941_s13 + $0x20] sm:$0xff] }
 0x589   :  { %1949 = vmatmul.mubr.msk.f32.gmra.mrb[8].mxu0 %vm412_vm7, %v500_v11  ;;  %v1266_v11 = vld [vmem:[%s2941_s13 + $0x28] sm:$0xff] }
 0x622   :  { %v1941_v14 = vpop.f32.mrb[2].mxu0 }
 0x623   :  { %v615_v15 = vpop.f32.mrb[3].mxu0 }
 0x626   :  { %v1944_v16 = vpop.f32.mrb[4].mxu0 }
 0x627   :  { %v625_v17 = vpop.f32.mrb[5].mxu0 }
 0x628   :  { %1953 = vmatprep.mubr.msk.f32.mxu0 %vm250_vm5, %v625_v17  ;;  %v1268_v17 = vld [vmem:[%s2941_s13 + $0x38] sm:$0xff] }
 0x629   :  { %1954 = vmatmul.mubr.msk.f32.vlgmr.msra.gmra.mrb[10].mxu0 %vm250_vm5, %v1944_v16  ;;  %v1267_v16 = vld [vmem:[%s2941_s13 + $0x30] sm:$0xff] }
 0x62a   :  { %1958 = vmatprep.mubr.msk.f32.mxu0 %vm250_vm5, %v615_v15  ;;  %1957 = vmatpush3.msra.mxu0 %v654_v13  ;;  %v1284_v13 = vld [vmem:[%s2941_s13 + $0xb8] sm:$0xff] }
 0x62b   :  { %1961 = vmatprep.subr.mxu0 %v656_v18  ;;  %v2065_v15 = vpack.c.bf16 %v1284_v13, %v1283_v12  ;;  %v1294_v12 = vld [vmem:[%s2941_s13 + $0x108] sm:$0xff]  ;;  %v1311_v13 = vld [vmem:[%s2941_s13 + $0x190] sm:$0xff] }
 0x631   :  { %1959 = vmatmul.mubr.msk.f32.vlgmr.msra.gmra.mrb[10].mxu0 %vm250_vm5, %v1941_v14  ;;  %v2063_v14 = vpack.c.bf16 %v1266_v11, %v1265_v10  ;;  %v2085_v10 = vpack.c.bf16 %v1310_v54, %v1309_v8  ;;  %v1293_v11 = vld [vmem:[%s2941_s13 + $0x100] sm:$0xff] }
 0x632   :  { %1962 = vmatpush3.msra.mxu0 %v656_v18  ;;  %v1285_v18 = vld [vmem:[%s2941_s13 + $0xc0] sm:$0xff] }
 0x633   :  { %1966 = vmatprep.subr.mxu0 %v657_v19  ;;  %v1071_v54 = vld [vmem:[%s2940_s12] sm:$0xf] }
 0x655   :  { %v1947_v20 = vpop.f32.mrb[6].mxu0 }
 0x656   :  { %v635_v21 = vpop.f32.mrb[7].mxu0 }
 0x657   :  { %1963 = vmatprep.mubr.msk.f32.mxu0 %vm250_vm5, %v635_v21 }
 0x658   :  { %1964 = vmatmul.mubr.msk.f32.vlgmr.msra.gmra.mrb[10].mxu0 %vm250_vm5, %v1947_v20  ;;  %v2067_v20 = vpack.c.bf16 %v1268_v17, %v1267_v16  ;;  %v1295_v17 = vld [vmem:[%s2941_s13 + $0x110] sm:$0xff] }
 0x659   :  { %1967 = vmatpush3.msra.mxu0 %v657_v19  ;;  %v1286_v19 = vld [vmem:[%s2941_s13 + $0xc8] sm:$0xff] }
 0x65a   :  { %2054 = vmatprep.subr.bf16.mxu0 %v2053_v63  ;;  %v2069_v21 = vpack.c.bf16 %v1286_v19, %v1285_v18  ;;  %v1296_v18 = vld [vmem:[%s2941_s13 + $0x118] sm:$0xff]  ;;  %v1313_v19 = vld [vmem:[%s2941_s13 + $0x1a0] sm:$0xff] }
 0x65c   :  { %v1950_v22 = vpop.f32.mrb[8].mxu0 }
 0x65d   :  { %v645_v23 = vpop.f32.mrb[9].mxu0 }
 0x65e   :  { %1968 = vmatprep.mubr.msk.f32.mxu0 %vm250_vm5, %v645_v23  ;;  %v1270_v23 = vld [vmem:[%s2941_s13 + $0x48] sm:$0xff] }
 0x660   :  { %1969 = vmatmul.mubr.msk.f32.vlgmr.msra.gmra.mrb[10].mxu0 %vm250_vm5, %v1950_v22  ;;  %v1269_v22 = vld [vmem:[%s2941_s13 + $0x40] sm:$0xff] }
 0x661   :  { %2056 = vmatpush3.bf16.msra.mxu0 %v2055_v4 }
 0x662   :  { %2058 = vmatprep.subr.bf16.mxu0 %v2057_v5  ;;  %v1065_v5 = vld [vmem:[%s2939_s11 + $0x50] sm:$0xff] }
 0x665   :  { %2060 = vmatpush3.bf16.msra.mxu0 %v2059_v9  ;;  %v2051_v9 = vpack.c.bf16 %v1069_v6, %v1065_v5  ;;  %v1073_v6 = vlaneseq }
 0x666   :  { %2062 = vmatprep.subr.bf16.mxu0 %v2061_v51 }
 0x669   :  { %2064 = vmatpush3.bf16.msra.mxu0 %v2063_v14  ;;  %v1312_v14 = vld [vmem:[%s2941_s13 + $0x198] sm:$0xff] }
 0x66a   :  { %2066 = vmatprep.subr.bf16.mxu0 %v2065_v15  ;;  %v2087_v15 = vpack.c.bf16 %v1294_v12, %v1293_v11  ;;  %v2089_v16 = vpack.c.bf16 %v1312_v14, %v1311_v13 }
 0x66d   :  { %2068 = vmatpush3.bf16.msra.mxu0 %v2067_v20  ;;  %v1314_v20 = vld [vmem:[%s2941_s13 + $0x1a8] sm:$0xff] }
 0x66e   :  { %2070 = vmatprep.subr.bf16.mxu0 %v2069_v21  ;;  %v2091_v21 = vpack.c.bf16 %v1296_v18, %v1295_v17 }
 0x733   :  { %v1970_v25 = vpop.f32.mrb[10].mxu0 }
 0x734   :  { %v975_v26 = vpop.f32.mrb[11].mxu0  ;;  %v994_v27 = vadd.f32 %v1970_v25, %v1735_v24  ;;  %v1288_v25 = vld [vmem:[%s2941_s13 + $0xd8] sm:$0xff] }
 0x735   :  { %v993_v28 = vadd.f32 %v1735_v24, %v975_v26  ;;  %v1287_v24 = vld [vmem:[%s2941_s13 + $0xd0] sm:$0xff]  ;;  %v2071_v26 = vpack.c.bf16 %v1270_v23, %v1269_v22  ;;  %v2093_v22 = vpack.c.bf16 %v1314_v20, %v1313_v19  ;;  %v1297_v23 = vld [vmem:[%s2941_s13 + $0x120] sm:$0xff] }
 0x736   :  { %v2581_v30 = vadd.f32 %v994_v27, %v2425_v45  ;;  %v2073_v27 = vpack.c.bf16 %v1288_v25, %v1287_v24  ;;  %v1298_v24 = vld [vmem:[%s2941_s13 + $0x128] sm:$0xff]  ;;  %v1315_v25 = vld [vmem:[%s2941_s13 + $0x1b0] sm:$0xff] }
 0x737   :  { %v2578_v29 = vadd.f32 %v993_v28, %v2421_v42  ;;  %v1271_v28 = vld [vmem:[%s2941_s13 + $0x50] sm:$0xff]  ;;  %2072 = vmatpush3.bf16.msra.mxu0 %v2071_v26  ;;  %v2095_v26 = vpack.c.bf16 %v1298_v24, %v1297_v23 }
 0x738   :  { %v1002_v32 = vsel %vm69_vm0, %v2581_v30, 0.0  ;;  %2074 = vmatprep.subr.bf16.mxu0 %v2073_v27 }
 0x739   :  { %v999_v31 = vsel %vm69_vm0, %v2578_v29, 0.0 }
 0x73a   :  { %1000 = vadd.xlane.f32.xlu1 %v999_v31  ;;  %v1272_v31 = vld [vmem:[%s2941_s13 + $0x58] sm:$0xff] }
 0x73e   :  { %1003 = vadd.xlane.f32.xlu1 %v1002_v32  ;;  %v1289_v32 = vld [vmem:[%s2941_s13 + $0xe0] sm:$0xff] }
 0x7c7   :  { %v1001_v33 = vpop.xlane.xlu1 %1000 }
 0x7c8   :  { %v1005_v34 = vmul.f32 0.03125, %v1001_v33  ;;  %v1290_v33 = vld [vmem:[%s2941_s13 + $0xe8] sm:$0xff] }
 0x7ca   :  { %v2588_v35 = vsub.f32 %v2578_v29, %v1005_v34  ;;  %v2075_v34 = vpack.c.bf16 %v1272_v31, %v1271_v28  ;;  %v1299_v28 = vld [vmem:[%s2941_s13 + $0x130] sm:$0xff]  ;;  %v1300_v31 = vld [vmem:[%s2941_s13 + $0x138] sm:$0xff] }
 0x7cb   :  { %v1004_v36 = vpop.xlane.xlu1 %1003 }
 0x7cc   :  { %v1006_v37 = vmul.f32 0.03125, %v1004_v36  ;;  %v1009_v42 = vmul.f32 %v2588_v35, %v2588_v35  ;;  %v2077_v36 = vpack.c.bf16 %v1290_v33, %v1289_v32  ;;  %2076 = vmatpush3.bf16.msra.mxu0 %v2075_v34  ;;  %v1043_v56 = vmul.f32 %v1736_v55, %v2588_v35  ;;  %v1070_v35 = vld [vmem:[%s2939_s11 + $0x78] sm:$0xff]  ;;  %v1317_v32 = vld [vmem:[%s2941_s13 + $0x1c0] sm:$0xff]  ;;  %v1318_v33 = vld [vmem:[%s2941_s13 + $0x1c8] sm:$0xff] }
 0x7cd   :  { %v2049_v4 = vpack.c.bf16 %v1070_v35, %v1066_v62  ;;  %v2099_v34 = vpack.c.bf16 %v1300_v31, %v1299_v28  ;;  %v1306_v62 = vld [vmem:[%s2941_s13 + $0x168] sm:$0xff] }
 0x7ce   :  { %v2593_v45 = vsub.f32 %v2581_v30, %v1006_v37  ;;  %v1011_v38 = vsel %vm69_vm0, %v1009_v42, 0.0  ;;  %2078 = vmatprep.subr.bf16.mxu0 %v2077_v36  ;;  %v2101_v36 = vpack.c.bf16 %v1318_v33, %v1317_v32 }
 0x7cf   :  { %1012 = vadd.xlane.f32.xlu1 %v1011_v38 }
 0x7d0   :  { %v1010_v58 = vmul.f32 %v2593_v45, %v2593_v45  ;;  %v1044_v2 = vmul.f32 %v1736_v55, %v2593_v45  ;;  %v1304_v55 = vld [vmem:[%s2941_s13 + $0x158] sm:$0xff] }
 0x7d2   :  { %v1014_v1 = vsel %vm69_vm0, %v1010_v58, 0.0 }
 0x7d3   :  { %1015 = vadd.xlane.f32.xlu0 %v1014_v1 }
 0x85c   :  { %v1013_v37 = vpop.xlane.xlu1 %1012 }
 0x85d   :  { %v1017_v42 = vmul.f32 0.032258064, %v1013_v37  ;;  %v1273_v37 = vld [vmem:[%s2941_s13 + $0x60] sm:$0xff] }
 0x85f   :  { %2227 = vrsqrt.f32 %v1017_v42  ;;  %vm1021_vm8 = vcmp.eq.f32.partialorder %v1017_v42, inf  ;;  %v1024_v40 = vand.u32 2147483648, %v1017_v42  ;;  %vm1023_vm9 = vcmp.eq.f32.partialorder %v1017_v42, 0.0 }
 0x860   :  { %v1016_v38 = vpop.xlane.xlu0 %1015 }
 0x861   :  { %v1018_v58 = vmul.f32 0.032258064, %v1016_v38  ;;  %v1301_v38 = vld [vmem:[%s2941_s13 + $0x140] sm:$0xff] }
 0x863   :  { %2229 = vrsqrt.f32 %v1018_v58  ;;  %vm1028_vm10 = vcmp.eq.f32.partialorder %v1018_v58, inf  ;;  %v1031_v49 = vand.u32 2147483648, %v1018_v58  ;;  %vm1030_vm11 = vcmp.eq.f32.partialorder %v1018_v58, 0.0 }
 0x869   :  { %v2228_v1 = vpop.eup %2227 }
 0x86a   :  { %v1020_v39 = vmul.f32 %v2228_v1, %v1017_v42  ;;  %v1302_v1 = vld [vmem:[%s2941_s13 + $0x148] sm:$0xff] }
 0x86c   :  { %v1022_v41 = vsel %vm1021_vm8, %v1017_v42, %v1020_v39  ;;  %v1274_v42 = vld [vmem:[%s2941_s13 + $0x68] sm:$0xff]  ;;  %v2103_v39 = vpack.c.bf16 %v1302_v1, %v1301_v38 }
 0x86d   :  { %v2230_v43 = vpop.eup %2229  ;;  %v1025_v44 = vsel %vm1023_vm9, %v1024_v40, %v1022_v41  ;;  %v1291_v40 = vld [vmem:[%s2941_s13 + $0xf0] sm:$0xff]  ;;  %v1292_v41 = vld [vmem:[%s2941_s13 + $0xf8] sm:$0xff]  ;;  %v1487_v1 = vld [vmem:[%s2943_s15 + $0x8] sm:$0xff] }
 0x86e   :  { %v1033_v46 = vadd.f32 1e-06, %v1025_v44  ;;  %v1027_v47 = vmul.f32 %v2230_v43, %v1018_v58  ;;  %v1319_v43 = vld [vmem:[%s2941_s13 + $0x1d0] sm:$0xff]  ;;  %v2081_v44 = vpack.c.bf16 %v1292_v41, %v1291_v40  ;;  %v1490_v40 = vld [vmem:[%s2944_s16] sm:$0xff]  ;;  %v1491_v41 = vld [vmem:[%s2944_s16 + $0x8] sm:$0xff] }
 0x870   :  { %2231 = vrcp.f32 %v1033_v46  ;;  %v1029_v50 = vsel %vm1028_vm10, %v1018_v58, %v1027_v47  ;;  %v2079_v58 = vpack.c.bf16 %v1274_v42, %v1273_v37  ;;  %v1320_v46 = vld [vmem:[%s2941_s13 + $0x1d8] sm:$0xff]  ;;  %v1275_v47 = vld [vmem:[%s2941_s13 + $0x70] sm:$0xff] }
 0x871   :  { %v1032_v52 = vsel %vm1030_vm11, %v1031_v49, %v1029_v50  ;;  %v1276_v49 = vld [vmem:[%s2941_s13 + $0x78] sm:$0xff]  ;;  %v2105_v50 = vpack.c.bf16 %v1320_v46, %v1319_v43  ;;  %v2117_v43 = vpack.c.bf16 %v1491_v41, %v1490_v40 }
 0x872   :  { %v1034_v53 = vadd.f32 1e-06, %v1032_v52  ;;  %2080 = vmatpush3.bf16.msra.mxu0 %v2079_v58  ;;  %v2083_v52 = vpack.c.bf16 %v1276_v49, %v1275_v47  ;;  %v1486_v58 = vld [vmem:[%s2943_s15] sm:$0xff]  ;;  %v1489_v46 = vld [vmem:[%s2943_s15 + $0x18] sm:$0xff] }
 0x873   :  { %2082 = vmatprep.subr.bf16.mxu0 %v2081_v44  ;;  %v1488_v44 = vld [vmem:[%s2943_s15 + $0x10] sm:$0xff]  ;;  %v65_v49 = vld [vmem:[%s2961_s21] sm:$0xff] }
 0x874   :  { %2233 = vrcp.f32 %v1034_v53  ;;  %v1303_v53 = vld [vmem:[%s2941_s13 + $0x150] sm:$0xff]  ;;  %v2125_v47 = vpack.c.bf16 %v1489_v46, %v1488_v44 }
 0x876   :  { %2084 = vmatpush3.bf16.msra.mxu0 %v2083_v52 }
 0x87a   :  { %v2232_v60 = vpop.eup %2231 }
 0x87b   :  { %v1045_v63 = vmul.f32 %v2232_v60, %v1043_v56  ;;  %v2107_v56 = vpack.c.bf16 %v1304_v55, %v1303_v53  ;;  %v2109_v60 = vpack.c.bf16 %v1322_v59, %v1321_v57 }
 0x87d   :  { %v1053_v3 = vadd.f32 %v1737_v61, %v1045_v63  ;;  %v1323_v63 = vld [vmem:[%s2941_s13 + $0x1f0] sm:$0xff] }
 0x87e   :  { %v2234_v7 = vpop.eup %2233 }
 0x87f   :  { %1738 = vmatmul.mubr.msk.f32.vlgmr.msra.gmra.mrb[8].mxu1 %vm69_vm0, %v1053_v3  ;;  %v1046_v45 = vmul.f32 %v2234_v7, %v1044_v2  ;;  %v1074_v7 = vshrl.u32 %v1073_v6, 7 }
 0x880   :  { %2048 = vmatpush1.bf16.msra.mxu1 %v2047_v0  ;;  %1169 = vmatprep.mubr.f32.mxu1 %v2288_v48  ;;  %v1324_v0 = vld [vmem:[%s2941_s13 + $0x1f8] sm:$0xff] }
 0x881   :  { %2050 = vmatprep.subr.bf16.mxu1 %v2049_v4  ;;  %v1054_v51 = vadd.f32 %v1737_v61, %v1046_v45  ;;  %v1305_v61 = vld [vmem:[%s2941_s13 + $0x160] sm:$0xff]  ;;  %v2113_v2 = vpack.c.bf16 %v1324_v0, %v1323_v63  ;;  %v1308_v4 = vld [vmem:[%s2941_s13 + $0x178] sm:$0xff]  ;;  %v1075_v8 = vsub.s32 0, %v1074_v7  ;;  %v1079_v45 = vsub.s32 1, %v1074_v7 }
 0x882   :  { %v2111_v35 = vpack.c.bf16 %v1306_v62, %v1305_v61  ;;  %v1083_v13 = vsub.s32 2, %v1074_v7 }
 0x883   :  { %1739 = vmatmul.mubr.msk.f32.gmra.mrb[10].mxu1 %vm69_vm0, %v1054_v51 }
 0x884   :  { %2052 = vmatpush1.bf16.msra.mxu1 %v2051_v9  ;;  %1240 = vmatprep.mubr.f32.mxu1 %v2288_v48  ;;  %v1076_v9 = vrot.slane %v1071_v54, %v1075_v8 }
 0x885   :  { %2086 = vmatprep.subr.bf16.mxu1 %v2085_v10 }
 0x887   :  { %1740 = vmatmul.mubr.msk.f32.vlgmr.msra.gmra.mrb[12].mxu1 %vm69_vm0, %v1053_v3  ;;  %v1307_v3 = vld [vmem:[%s2941_s13 + $0x170] sm:$0xff] }
 0x888   :  { %1246 = vmatprep.mubr.f32.mxu1 %v2288_v48  ;;  %2088 = vmatpush3.bf16.msra.mxu1 %v2087_v15  ;;  %v1316_v48 = vld [vmem:[%s2941_s13 + $0x1b8] sm:$0xff]  ;;  %v2115_v5 = vpack.c.bf16 %v1308_v4, %v1307_v3  ;;  %v1087_v15 = vsub.s32 3, %v1074_v7 }
 0x889   :  { %2090 = vmatprep.subr.bf16.mxu1 %v2089_v16  ;;  %v2097_v27 = vpack.c.bf16 %v1316_v48, %v1315_v25 }
 0x88a   :  { %v1088_v23 = vrot.slane %v1071_v54, %v1087_v15 }
 0x88b   :  { %1741 = vmatmul.mubr.msk.f32.gmra.mrb[14].mxu1 %vm69_vm0, %v1054_v51  ;;  %v1080_v51 = vrot.slane %v1071_v54, %v1079_v45 }
 0x88c   :  { %2092 = vmatpush3.bf16.msra.mxu1 %v2091_v21  ;;  %v1084_v21 = vrot.slane %v1071_v54, %v1083_v13 }
 0x88d   :  { %2094 = vmatprep.subr.bf16.mxu1 %v2093_v22 }
 0x890   :  { %2096 = vmatpush3.bf16.msra.mxu1 %v2095_v26 }
 0x891   :  { %2098 = vmatprep.subr.bf16.mxu1 %v2097_v27 }
 0x894   :  { %2100 = vmatpush3.bf16.msra.mxu1 %v2099_v34 }
 0x895   :  { %2102 = vmatprep.subr.bf16.mxu1 %v2101_v36 }
 0x898   :  { %2104 = vmatpush3.bf16.msra.mxu1 %v2103_v39  ;;  %v2121_v39 = vpack.c.bf16 %v1487_v1, %v1486_v58 }
 0x899   :  { %2106 = vmatprep.subr.bf16.mxu1 %v2105_v50  ;;  %v66_v50 = vld [vmem:[%s2961_s21 + $0x8] sm:$0xff] }
 0x89a   :  { %2122 = vmatprep.subr.bf16.mxu0 %v2121_v39 }
 0x89c   :  { %2108 = vmatpush3.bf16.msra.mxu1 %v2107_v56 }
 0x89d   :  { %2110 = vmatprep.subr.bf16.mxu1 %v2109_v60  ;;  %v1742_v60 = vld [vmem:[%s2942_s14] ss:$0 sm:$0xff]  ;;  %s2289_s14 = smov [#allocation2]  }
 0x89e   :  { %s1671_s1 = sshll.u32 %s2289_s14, 4  ;;  %s1672_s1 = int_to_ptr.vmem [resolvable:$true] %s1671_s1 }
 0x89f   :  { %s2235_s22 = scalar_lea.vmem %s1672_s1, 256  ;;  %p2240_p1 = scmp.lt.s32.totalorder %s1672_s1, %s1672_s1 }
 0x8a0   :  { %2112 = vmatpush3.bf16.msra.mxu1 %v2111_v35  ;;  %p2236_p0 = scmp.ne.s32.totalorder %s1672_s1, %s2235_s22  ;;  %p2241_p2 = scmp.lt.s32.totalorder %s2235_s22, %s2235_s22 }
 0x8a1   :  { %2114 = vmatprep.subr.bf16.mxu1 %v2113_v2 }
 0x8a2   :  { %p2242_p3 = por %p2241_p2, %p2240_p1 }
 0x8a4   :  { %2116 = vmatpush3.bf16.msra.mxu1 %v2115_v5  ;;  %p2243_p4 = pnand %p2242_p3, %p2236_p0 }
 0x8a5   :  { %2118 = vmatprep.subr.bf16.mxu1 %v2117_v43 }
 0x952   :  { %v1165_v10 = vpop.f32.mrb[8].mxu1 }
 0x953   :  { %v1166_v11 = vadd.f32 %v1165_v10, %v1076_v9  ;;  %v1167_v12 = vpop.f32.mrb[9].mxu1 }
 0x954   :  { %v1168_v14 = vadd.f32 %v1167_v12, %v1080_v51 }
 0x955   :  { %v1253_v18 = vmax.f32 %v1166_v11, 0.0 }
 0x956   :  { %v1254_v16 = vmax.f32 %v1168_v14, 0.0  ;;  %v1171_v17 = vpop.f32.mrb[10].mxu1 }
 0x957   :  { %v1172_v19 = vadd.f32 %v1171_v17, %v1076_v9  ;;  %v1173_v20 = vpop.f32.mrb[11].mxu1 }
 0x958   :  { %v1174_v22 = vadd.f32 %v1173_v20, %v1080_v51  ;;  %1396 = vmatprep.mubr.f32.mxu0 %v1254_v16 }
 0x959   :  { %1397 = vmatmul.mubr.f32.vlgmr.msra.gmra.mrb[12].mxu0 %v1253_v18  ;;  %v1257_v48 = vmax.f32 %v1172_v19, 0.0 }
 0x95a   :  { %v1258_v24 = vmax.f32 %v1174_v22, 0.0  ;;  %v1242_v25 = vpop.f32.mrb[12].mxu1  ;;  %2124 = vmatpush3.bf16.msra.mxu0 %v2121_v39 }
 0x95b   :  { %v1243_v26 = vadd.f32 %v1242_v25, %v1084_v21  ;;  %v1244_v27 = vpop.f32.mrb[13].mxu1  ;;  %2126 = vmatprep.subr.bf16.mxu0 %v2125_v47 }
 0x95c   :  { %v1245_v28 = vadd.f32 %v1244_v27, %v1088_v23  ;;  %1401 = vmatprep.mubr.f32.mxu0 %v1258_v24 }
 0x95d   :  { %1402 = vmatmul.mubr.f32.gmra.mrb[14].mxu0 %v1257_v48  ;;  %v1255_v33 = vmax.f32 %v1243_v26, 0.0 }
 0x95e   :  { %v1256_v31 = vmax.f32 %v1245_v28, 0.0  ;;  %v1248_v32 = vpop.f32.mrb[14].mxu1  ;;  %2128 = vmatpush3.bf16.msra.mxu0 %v2125_v47 }
 0x95f   :  { %v1249_v34 = vadd.f32 %v1248_v32, %v1084_v21  ;;  %v1250_v36 = vpop.f32.mrb[15].mxu1 }
 0x960   :  { %v1251_v37 = vadd.f32 %v1250_v36, %v1088_v23  ;;  %1471 = vmatprep.mubr.f32.mxu1 %v1256_v31 }
 0x961   :  { %1472 = vmatmul.mubr.f32.vlgmr.msra.gmra.mrb[16].mxu1 %v1255_v33  ;;  %v1259_v38 = vmax.f32 %v1249_v34, 0.0 }
 0x962   :  { %v1260_v42 = vmax.f32 %v1251_v37, 0.0  ;;  %2120 = vmatpush3.bf16.msra.mxu1 %v2117_v43 }
 0x964   :  { %1476 = vmatprep.mubr.f32.mxu1 %v1260_v42 }
 0x965   :  { %1477 = vmatmul.mubr.f32.gmra.mrb[18].mxu1 %v1259_v38 }
 0x966   :  { %1975 = vmatprep.mubr.msk.f32.mxu1 %vm1492_vm12, %v65_v49 }
 0x969   :  { %1976 = vmatmul.mubr.msk.f32.vlgmr.msra.gmra.mrb[20].mxu1 %vm1492_vm12, %v66_v50 }
 0xa2c   :  { %v1830_v52 = vpop.f32.mrb[12].mxu0 }
 0xa2d   :  { %v1831_v53 = vpop.f32.mrb[13].mxu0 }
 0xa2e   :  { %v1832_v55 = vadd.f32 %v1831_v53, %v1830_v52 }
 0xa30   :  { %v1833_v56 = vpop.f32.mrb[14].mxu0  ;;  %v1399_v35 = vadd.f32 %v1832_v55, %v1742_v60 }
 0xa31   :  { %v1834_v57 = vpop.f32.mrb[15].mxu0 }
 0xa32   :  { %v1835_v59 = vadd.f32 %v1834_v57, %v1833_v56 }
 0xa34   :  { %v1868_v61 = vpop.f32.mrb[16].mxu1  ;;  %v1404_v4 = vadd.f32 %v1835_v59, %v1742_v60 }
 0xa35   :  { %v1869_v62 = vpop.f32.mrb[17].mxu1 }
 0xa36   :  { %v1870_v63 = vadd.f32 %v1869_v62, %v1868_v61 }
 0xa38   :  { %v1474_v0 = vadd.f32 %v1870_v63, %v1399_v35  ;;  %v1871_v2 = vpop.f32.mrb[18].mxu1 }
 0xa39   :  { %v1872_v3 = vpop.f32.mrb[19].mxu1 }
 0xa3a   :  { %v1482_v5 = vadd.f32 %v1474_v0, %v2578_v29  ;;  %v1873_v6 = vadd.f32 %v1872_v3, %v1871_v2 }
 0xa3c   :  { %1484 = vst.msk [vmem:[#allocation2] sm:$0xff] %vm69_vm0, %v1482_v5  ;;  %v1479_v7 = vadd.f32 %v1873_v6, %v1404_v4  ;;  %1986 = vmatprep.mubr.msk.f32.mxu0 %vm69_vm0, %v1482_v5  ;;  %v1977_v54 = vpop.f32.mrb[20].mxu1 }
 0xa3d   :  { %v1565_v45 = vpop.f32.mrb[21].mxu1 }
 0xa3e   :  { %v1483_v8 = vadd.f32 %v1479_v7, %v2581_v30 }
 0xa40   :  { %1485 = vst.msk [vmem:[#allocation2 + $0x8] sm:$0xff] %vm69_vm0, %v1483_v8  ;;  %1987 = vmatmul.mubr.msk.f32.vlgmr.msra.gmra.mrb[16].mxu0 %vm69_vm0, %v1483_v8 }
 0xa41   :  { %2246 = shalt.err (!%p2243_p4)
}
 0xa42   :  { %s2247_s4 = scalar_lea.hbm %s2946_s18, 256 }
 0xa43   :  { %p2248_p5 = scmp.ne.s32.totalorder %s2946_s18, %s2247_s4  ;;  %p2251_p6 = scmp.lt.u32.totalorder %s2247_s4, %s2946_s18 }
 0xa45   :  { %p2253_p7 = pnand %p2251_p6, %p2248_p5 }
 0xa47   :  { %2256 = shalt.err (!%p2253_p7)
}
 0xa48   :  { %s2290_s13 = smov 128   ;;  %s2291_s3 = smov 8   ;;  %v1747_v30 = vld [vmem:[%s2945_s17] ss:$0 sm:$0xff] }
 0xa49   :  { %1677 = dma.vmem_to_hbm [thread:$0]  %s1672_s1, 256, %s2946_s18, [#allocation3], %s2290_s13, %s2290_s13, %s2291_s3  }
 0xa4a   :  { %s2292_s0 = smov [#allocation4]  }
 0xa4b   :  { %s1683_s5 = sshll.u32 %s2292_s0, 4  ;;  %s1684_s5 = int_to_ptr.vmem [resolvable:$true] %s1683_s5 }
 0xa4c   :  { %s2257_s6 = scalar_lea.vmem %s1684_s5, 256  ;;  %p2262_p9 = scmp.lt.s32.totalorder %s1684_s5, %s1684_s5 }
 0xa4d   :  { %p2258_p8 = scmp.ne.s32.totalorder %s1684_s5, %s2257_s6  ;;  %p2263_p10 = scmp.lt.s32.totalorder %s2257_s6, %s2257_s6 }
 0xa4f   :  { %p2264_p11 = por %p2263_p10, %p2262_p9 }
 0xa51   :  { %p2265_p12 = pnand %p2264_p11, %p2258_p8 }
 0xb13   :  { %v1988_v29 = vpop.f32.mrb[16].mxu0 }
 0xb14   :  { %v1652_v9 = vadd.f32 %v1988_v29, %v1977_v54  ;;  %v1646_v51 = vpop.f32.mrb[17].mxu0 }
 0xb15   :  { %v1647_v10 = vadd.f32 %v1646_v51, %v1565_v45 }
 0xb16   :  { %v1663_v11 = vadd.f32 %v1747_v30, %v1652_v9 }
 0xb17   :  { %v1662_v12 = vadd.f32 %v1747_v30, %v1647_v10 }
 0xb18   :  { %1665 = vst.msk [vmem:[#allocation4 + $0x8] sm:$0xff] %vm1492_vm12, %v1663_v11 }
 0xb19   :  { %1664 = vst.msk [vmem:[#allocation4] sm:$0xff] %vm1492_vm12, %v1662_v12 }
 0xb1a   :  { %2268 = shalt.err (!%p2265_p12)
}
 0xb1b   :  { %s2269_s9 = scalar_lea.hbm %s2947_s19, 256 }
 0xb1c   :  { %p2270_p13 = scmp.ne.s32.totalorder %s2947_s19, %s2269_s9  ;;  %p2273_p0 = scmp.lt.u32.totalorder %s2269_s9, %s2947_s19 }
 0xb1e   :  { %p2275_p1 = pnand %p2273_p0, %p2270_p13 }
 0xb20   :  { %2278 = shalt.err (!%p2275_p1)
}
 0xb21   :  { %1689 = dma.vmem_to_hbm [thread:$0]  %s1684_s5, 256, %s2947_s19, [#allocation5], %s2290_s13, %s2290_s13, %s2291_s3  }
 0xb22   :  { %2279 = dma.done.wait [#allocation3], 256  }
 0xb23   :  { %2280 = vsyncadd [#allocation3], 4294967040 }
 0xb24   :  { %2281 = dma.done.wait [#allocation5], 256  }
 0xb25   :  { %2282 = vsyncadd [#allocation5], 4294967040 }
 0xb26   :  { %1696 = vsyncpa [#allocation3], 1 }
 0xb27   :  { %1697 = vsyncpa [#allocation5], 1 }

</bundles_post_ra>
